<compile_context>
chip_gen: v7x
topology: tpu7x:2x2x1
jax: 0.10.0
libtpu: 0.0.40
codegen_flags: <defaults>
</compile_context>

<pallas_src>
import functools

import jax
import jax.numpy as jnp
import numpy as np
from jax import lax
from jax.experimental import pallas as pl
from jax.experimental.pallas import tpu as pltpu

EPS = 1e-5
LANE = 128


def _round_up(x, m):
    return (x + m - 1) // m * m


def _pick_tile_h(h, w, max_rows=4096):
    """Largest divisor th of h with th*(w+2) <= max_rows (VMEM-friendly tiles)."""
    best = 1
    for th in range(1, h + 1):
        if h % th == 0 and th * (w + 2) <= max_rows:
            best = th
    return best


def _conv_stats_kernel(x_ref, w_ref, mask_ref, y_ref, psum_ref, psq_ref, *, wp2):
    """3x3 conv of one H-tile as 9 shifted matmuls + masked partial BN stats.

    x_ref:    (R_in, Cin)         bf16  flattened padded rows of the tile
    w_ref:    (9, Cin, Cout_pad)  bf16  per-tap weights (lane padded)
    mask_ref: (MP_pad, 1)         f32   1.0 on valid output rows, 0.0 on junk
    y_ref:    (MP_pad, Cout_pad)  f32   conv output in "wide" layout (W+2 cols)
    psum/psq: (1, Cout_pad)       f32   per-tile sum / sum-of-squares (masked)
    """
    mp_pad, cp = y_ref.shape
    acc = jnp.zeros((mp_pad, cp), jnp.float32)
    for dy in range(3):                       # static unrolled 3x3 taps
        for dx in range(3):
            start = dy * wp2 + dx
            a = x_ref[start:start + mp_pad, :]          # (MP_pad, Cin) bf16
            acc = acc + jnp.dot(a, w_ref[dy * 3 + dx],
                                preferred_element_type=jnp.float32)
    y_ref[...] = acc
    accv = acc * mask_ref[...]                           # zero out junk rows
    psum_ref[...] = jnp.sum(accv, axis=0, keepdims=True)
    psq_ref[...] = jnp.sum(accv * accv, axis=0, keepdims=True)


def _bn_act_kernel(y_ref, scale_ref, shift_ref, o_ref, *, slope):
    """Apply folded BatchNorm scale/shift + LeakyReLU on one row tile."""
    z = y_ref[...] * scale_ref[...] + shift_ref[...]
    o_ref[...] = jnp.where(z >= 0.0, z, slope * z)


def conv_block(x_nchw, weight_hwio, bias, gamma, beta, *, relu_slop=0.0):
    """ConvBlock forward. x_nchw: (N, Cin, H, W) -> (N, Cout, H, W).

    `bias` is accepted for API parity but unused: a per-channel constant added
    before batch-statistics BatchNorm cancels exactly.
    """
    del bias
    n, cin, h, w = x_nchw.shape
    kh, kw, cin_w, cout = weight_hwio.shape
    assert cin_w == cin and kh == 3 and kw == 3

    cout_pad = _round_up(cout, LANE)
    th = _pick_tile_h(h, w)
    nh = h // th
    wp2 = w + 2
    mp = th * wp2                               # wide output rows per tile
    mp_pad = _round_up(mp, 8)
    r_in = _round_up((th + 2) * wp2 + 16, 8)    # input rows per tile (+ slack)

    # ---- host-side layout prep (cheap pad/reshape; no im2col materialization) ----
    x_nhwc = jnp.transpose(x_nchw, (0, 2, 3, 1)).astype(jnp.bfloat16)
    xp = jnp.pad(x_nhwc, ((0, 0), (1, 1), (1, 1), (0, 0)))   # (N, H+2, W+2, Cin)
    if nh == 1:
        tiles = xp[:, None]                                  # (N, 1, H+2, W+2, Cin)
    else:  # duplicate 2 halo rows per H-tile (few % overhead, tiling enabler)
        tiles = jnp.stack([xp[:, i * th:i * th + th + 2] for i in range(nh)], 1)
    x_flat = tiles.reshape(n, nh, (th + 2) * wp2, cin)
    x_flat = jnp.pad(x_flat, ((0, 0), (0, 0), (0, r_in - (th + 2) * wp2), (0, 0)))

    w_k = jnp.pad(weight_hwio, ((0, 0), (0, 0), (0, 0), (0, cout_pad - cout)))
    w_k = w_k.reshape(9, cin, cout_pad).astype(jnp.bfloat16)

    rows = np.arange(mp_pad)
    mask_np = ((rows < mp) & ((rows % wp2) < w)).astype(np.float32)
    mask = jnp.asarray(mask_np).reshape(mp_pad, 1)

    vmem_limit = 32 * 1024 * 1024   # safe on v5e/v6e/v7x; tiles sized well below

    # ---- pass 1: conv (bf16 MXU, f32 acc) + per-tile partial BN statistics ----
    conv_wide, psum, psq = pl.pallas_call(
        functools.partial(_conv_stats_kernel, wp2=wp2),
        grid=(n, nh),
        in_specs=[
            pl.BlockSpec((None, None, r_in, cin), lambda b, i: (b, i, 0, 0)),
            pl.BlockSpec((9, cin, cout_pad), lambda b, i: (0, 0, 0)),
            pl.BlockSpec((mp_pad, 1), lambda b, i: (0, 0)),
        ],
        out_specs=[
            pl.BlockSpec((mp_pad, cout_pad), lambda b, i: (b * nh + i, 0)),
            pl.BlockSpec((None, None, 1, cout_pad), lambda b, i: (b, i, 0, 0)),
            pl.BlockSpec((None, None, 1, cout_pad), lambda b, i: (b, i, 0, 0)),
        ],
        out_shape=[
            jax.ShapeDtypeStruct((n * nh * mp_pad, cout_pad), jnp.float32),
            jax.ShapeDtypeStruct((n, nh, 1, cout_pad), jnp.float32),
            jax.ShapeDtypeStruct((n, nh, 1, cout_pad), jnp.float32),
        ],
        compiler_params=pltpu.CompilerParams(
            dimension_semantics=("parallel", "parallel"),
            vmem_limit_bytes=vmem_limit),
    )(x_flat, w_k, mask)

    # ---- fold batch stats into per-channel scale/shift (tiny XLA ops) ----
    cnt = float(n * h * w)
    mean = jnp.sum(psum, axis=(0, 1)) / cnt                   # (1, Cout_pad)
    ex2 = jnp.sum(psq, axis=(0, 1)) / cnt
    var = jnp.maximum(ex2 - mean * mean, 0.0)                 # biased variance
    inv = lax.rsqrt(var + EPS)
    gamma_p = jnp.pad(gamma.astype(jnp.float32), (0, cout_pad - cout)).reshape(1, cout_pad)
    beta_p = jnp.pad(beta.astype(jnp.float32), (0, cout_pad - cout)).reshape(1, cout_pad)
    scale = gamma_p * inv
    shift = beta_p - mean * scale

    # ---- pass 2: normalize + affine + LeakyReLU (lane-dense stores) ----
    out_wide = pl.pallas_call(
        functools.partial(_bn_act_kernel, slope=float(relu_slop)),
        grid=(n * nh,),
        in_specs=[
            pl.BlockSpec((mp_pad, cout_pad), lambda j: (j, 0)),
            pl.BlockSpec((1, cout_pad), lambda j: (0, 0)),
            pl.BlockSpec((1, cout_pad), lambda j: (0, 0)),
        ],
        out_specs=pl.BlockSpec((mp_pad, cout_pad), lambda j: (j, 0)),
        out_shape=jax.ShapeDtypeStruct((n * nh * mp_pad, cout_pad), jnp.float32),
        compiler_params=pltpu.CompilerParams(
            dimension_semantics=("parallel",),
            vmem_limit_bytes=vmem_limit),
    )(conv_wide, scale, shift)

    # ---- strip tile/row/lane padding, back to NCHW ----
    out = out_wide.reshape(n * nh, mp_pad, cout_pad)[:, :mp, :]
    out = out.reshape(n, h, wp2, cout_pad)[:, :, :w, :cout]
    return jnp.transpose(out, (0, 3, 1, 2))


def conv_block_ref(x_nchw, weight_hwio, bias, gamma, beta, relu_slop=0.0):
    """Pure-JAX reference mirroring the PyTorch forward (incl. conv bias)."""
    y = lax.conv_general_dilated(
        x_nchw, weight_hwio, window_strides=(1, 1),
        padding=((1, 1), (1, 1)),
        dimension_numbers=("NCHW", "HWIO", "NCHW"))
    y = y + bias[None, :, None, None]
    mean = jnp.mean(y, axis=(0, 2, 3), keepdims=True)
    var = jnp.mean((y - mean) ** 2, axis=(0, 2, 3), keepdims=True)
    y = (y - mean) * lax.rsqrt(var + EPS)
    y = y * gamma[None, :, None, None] + beta[None, :, None, None]
    return jnp.where(y >= 0, y, relu_slop * y)


if __name__ == "__main__":
    # Small shapes consistent with the module: N=2, in_fea=4, out_fea=8, 16x16.
    N, CIN, COUT, H, W = 2, 4, 8, 16, 16

    key = jax.random.PRNGKey(0)
    kx, kw, kb = jax.random.split(key, 3)

    x = jax.random.normal(kx, (N, CIN, H, W), dtype=jnp.float32)

    fan_in = CIN * 3 * 3
    bound = 1.0 / np.sqrt(fan_in)
    weight_hwio = jax.random.uniform(kw, (3, 3, CIN, COUT), jnp.float32,
                                     -bound, bound)
    bias = jax.random.uniform(kb, (COUT,), jnp.float32, -bound, bound)
    gamma = jnp.ones((COUT,), jnp.float32)   # BatchNorm2d default weight
    beta = jnp.zeros((COUT,), jnp.float32)   # BatchNorm2d default bias

    # Round conv operands to bf16 once so the bf16-MXU kernel and the f32
    # reference see identical operand values (accumulation is f32 in both).
    x_b = x.astype(jnp.bfloat16).astype(jnp.float32)
    w_b = weight_hwio.astype(jnp.bfloat16).astype(jnp.float32)

    out = conv_block(x_b, w_b, bias, gamma, beta, relu_slop=0.0)
    out = jax.block_until_ready(out)

    ref = conv_block_ref(x_b, w_b, bias, gamma, beta, relu_slop=0.0)
    np.testing.assert_allclose(np.asarray(out), np.asarray(ref),
                               rtol=1e-3, atol=1e-3)

    print("KERNEL_OK")
</pallas_src>

<mosaic_0001>
module attributes {stable_mosaic.version = 11 : i64} {
  func.func @_conv_stats_kernel(%arg0: i32, %arg1: i32, %arg2: memref<1x1x344x4xbf16, #tpu.memory_space<vmem>>, %arg3: memref<9x4x128xbf16, #tpu.memory_space<vmem>>, %arg4: memref<288x1xf32, #tpu.memory_space<vmem>>, %arg5: memref<288x128xf32, #tpu.memory_space<vmem>>, %arg6: memref<1x1x1x128xf32, #tpu.memory_space<vmem>>, %arg7: memref<1x1x1x128xf32, #tpu.memory_space<vmem>>) attributes {dimension_semantics = [#tpu.dimension_semantics<parallel>, #tpu.dimension_semantics<parallel>], iteration_bounds = array<i64: 2, 1>, scalar_prefetch = 0 : i64, scratch_operands = 0 : i64, tpu.core_type = #tpu.core_type<tc>, window_params = [{transform_indices = @transform_0, window_bounds = array<i64: 1, 1, 344, 4>}, {pipeline_mode = #tpu.pipeline_mode<synchronous>, transform_indices = @transform_1, window_bounds = array<i64: 9, 4, 128>}, {pipeline_mode = #tpu.pipeline_mode<synchronous>, transform_indices = @transform_2, window_bounds = array<i64: 288, 1>}, {transform_indices = @transform_3, window_bounds = array<i64: 288, 128>}, {transform_indices = @transform_4, window_bounds = array<i64: 1, 1, 1, 128>}, {transform_indices = @transform_5, window_bounds = array<i64: 1, 1, 1, 128>}]} {
    %cst = arith.constant 0.000000e+00 : f32
    %0 = vector.broadcast %cst : f32 to vector<288x128xf32>
    %c0 = arith.constant 0 : index
    %c0_0 = arith.constant 0 : index
    %c0_1 = arith.constant 0 : index
    %c0_2 = arith.constant 0 : index
    %1 = vector.load %arg2[%c0, %c0_0, %c0_1, %c0_2] : memref<1x1x344x4xbf16, #tpu.memory_space<vmem>>, vector<1x1x288x4xbf16>
    %2 = vector.shape_cast %1 : vector<1x1x288x4xbf16> to vector<288x4xbf16>
    %c0_3 = arith.constant 0 : index
    %c0_4 = arith.constant 0 : index
    %c0_5 = arith.constant 0 : index
    %3 = vector.load %arg3[%c0_3, %c0_4, %c0_5] : memref<9x4x128xbf16, #tpu.memory_space<vmem>>, vector<1x4x128xbf16>
    %4 = vector.shape_cast %3 : vector<1x4x128xbf16> to vector<4x128xbf16>
    %cst_6 = arith.constant dense<0.000000e+00> : vector<288x128xf32>
    %5 = tpu.matmul %2, %4, %cst_6 {dimension_numbers = #tpu.dot_dimension_numbers<[1], [0], [0], [1], [0, 0, 1, 1], [], []>} : vector<288x4xbf16>, vector<4x128xbf16>, vector<288x128xf32> -> vector<288x128xf32>
    %6 = arith.addf %0, %5 : vector<288x128xf32>
    %c0_7 = arith.constant 0 : index
    %c0_8 = arith.constant 0 : index
    %c1 = arith.constant 1 : index
    %c0_9 = arith.constant 0 : index
    %7 = vector.load %arg2[%c0_7, %c0_8, %c1, %c0_9] : memref<1x1x344x4xbf16, #tpu.memory_space<vmem>>, vector<1x1x288x4xbf16>
    %8 = vector.shape_cast %7 : vector<1x1x288x4xbf16> to vector<288x4xbf16>
    %c1_10 = arith.constant 1 : index
    %c0_11 = arith.constant 0 : index
    %c0_12 = arith.constant 0 : index
    %9 = vector.load %arg3[%c1_10, %c0_11, %c0_12] : memref<9x4x128xbf16, #tpu.memory_space<vmem>>, vector<1x4x128xbf16>
    %10 = vector.shape_cast %9 : vector<1x4x128xbf16> to vector<4x128xbf16>
    %cst_13 = arith.constant dense<0.000000e+00> : vector<288x128xf32>
    %11 = tpu.matmul %8, %10, %cst_13 {dimension_numbers = #tpu.dot_dimension_numbers<[1], [0], [0], [1], [0, 0, 1, 1], [], []>} : vector<288x4xbf16>, vector<4x128xbf16>, vector<288x128xf32> -> vector<288x128xf32>
    %12 = arith.addf %6, %11 : vector<288x128xf32>
    %c0_14 = arith.constant 0 : index
    %c0_15 = arith.constant 0 : index
    %c2 = arith.constant 2 : index
    %c0_16 = arith.constant 0 : index
    %13 = vector.load %arg2[%c0_14, %c0_15, %c2, %c0_16] : memref<1x1x344x4xbf16, #tpu.memory_space<vmem>>, vector<1x1x288x4xbf16>
    %14 = vector.shape_cast %13 : vector<1x1x288x4xbf16> to vector<288x4xbf16>
    %c2_17 = arith.constant 2 : index
    %c0_18 = arith.constant 0 : index
    %c0_19 = arith.constant 0 : index
    %15 = vector.load %arg3[%c2_17, %c0_18, %c0_19] : memref<9x4x128xbf16, #tpu.memory_space<vmem>>, vector<1x4x128xbf16>
    %16 = vector.shape_cast %15 : vector<1x4x128xbf16> to vector<4x128xbf16>
    %cst_20 = arith.constant dense<0.000000e+00> : vector<288x128xf32>
    %17 = tpu.matmul %14, %16, %cst_20 {dimension_numbers = #tpu.dot_dimension_numbers<[1], [0], [0], [1], [0, 0, 1, 1], [], []>} : vector<288x4xbf16>, vector<4x128xbf16>, vector<288x128xf32> -> vector<288x128xf32>
    %18 = arith.addf %12, %17 : vector<288x128xf32>
    %c0_21 = arith.constant 0 : index
    %c0_22 = arith.constant 0 : index
    %c18 = arith.constant 18 : index
    %c0_23 = arith.constant 0 : index
    %19 = vector.load %arg2[%c0_21, %c0_22, %c18, %c0_23] : memref<1x1x344x4xbf16, #tpu.memory_space<vmem>>, vector<1x1x288x4xbf16>
    %20 = vector.shape_cast %19 : vector<1x1x288x4xbf16> to vector<288x4xbf16>
    %c3 = arith.constant 3 : index
    %c0_24 = arith.constant 0 : index
    %c0_25 = arith.constant 0 : index
    %21 = vector.load %arg3[%c3, %c0_24, %c0_25] : memref<9x4x128xbf16, #tpu.memory_space<vmem>>, vector<1x4x128xbf16>
    %22 = vector.shape_cast %21 : vector<1x4x128xbf16> to vector<4x128xbf16>
    %cst_26 = arith.constant dense<0.000000e+00> : vector<288x128xf32>
    %23 = tpu.matmul %20, %22, %cst_26 {dimension_numbers = #tpu.dot_dimension_numbers<[1], [0], [0], [1], [0, 0, 1, 1], [], []>} : vector<288x4xbf16>, vector<4x128xbf16>, vector<288x128xf32> -> vector<288x128xf32>
    %24 = arith.addf %18, %23 : vector<288x128xf32>
    %c0_27 = arith.constant 0 : index
    %c0_28 = arith.constant 0 : index
    %c19 = arith.constant 19 : index
    %c0_29 = arith.constant 0 : index
    %25 = vector.load %arg2[%c0_27, %c0_28, %c19, %c0_29] : memref<1x1x344x4xbf16, #tpu.memory_space<vmem>>, vector<1x1x288x4xbf16>
    %26 = vector.shape_cast %25 : vector<1x1x288x4xbf16> to vector<288x4xbf16>
    %c4 = arith.constant 4 : index
    %c0_30 = arith.constant 0 : index
    %c0_31 = arith.constant 0 : index
    %27 = vector.load %arg3[%c4, %c0_30, %c0_31] : memref<9x4x128xbf16, #tpu.memory_space<vmem>>, vector<1x4x128xbf16>
    %28 = vector.shape_cast %27 : vector<1x4x128xbf16> to vector<4x128xbf16>
    %cst_32 = arith.constant dense<0.000000e+00> : vector<288x128xf32>
    %29 = tpu.matmul %26, %28, %cst_32 {dimension_numbers = #tpu.dot_dimension_numbers<[1], [0], [0], [1], [0, 0, 1, 1], [], []>} : vector<288x4xbf16>, vector<4x128xbf16>, vector<288x128xf32> -> vector<288x128xf32>
    %30 = arith.addf %24, %29 : vector<288x128xf32>
    %c0_33 = arith.constant 0 : index
    %c0_34 = arith.constant 0 : index
    %c20 = arith.constant 20 : index
    %c0_35 = arith.constant 0 : index
    %31 = vector.load %arg2[%c0_33, %c0_34, %c20, %c0_35] : memref<1x1x344x4xbf16, #tpu.memory_space<vmem>>, vector<1x1x288x4xbf16>
    %32 = vector.shape_cast %31 : vector<1x1x288x4xbf16> to vector<288x4xbf16>
    %c5 = arith.constant 5 : index
    %c0_36 = arith.constant 0 : index
    %c0_37 = arith.constant 0 : index
    %33 = vector.load %arg3[%c5, %c0_36, %c0_37] : memref<9x4x128xbf16, #tpu.memory_space<vmem>>, vector<1x4x128xbf16>
    %34 = vector.shape_cast %33 : vector<1x4x128xbf16> to vector<4x128xbf16>
    %cst_38 = arith.constant dense<0.000000e+00> : vector<288x128xf32>
    %35 = tpu.matmul %32, %34, %cst_38 {dimension_numbers = #tpu.dot_dimension_numbers<[1], [0], [0], [1], [0, 0, 1, 1], [], []>} : vector<288x4xbf16>, vector<4x128xbf16>, vector<288x128xf32> -> vector<288x128xf32>
    %36 = arith.addf %30, %35 : vector<288x128xf32>
    %c0_39 = arith.constant 0 : index
    %c0_40 = arith.constant 0 : index
    %c36 = arith.constant 36 : index
    %c0_41 = arith.constant 0 : index
    %37 = vector.load %arg2[%c0_39, %c0_40, %c36, %c0_41] : memref<1x1x344x4xbf16, #tpu.memory_space<vmem>>, vector<1x1x288x4xbf16>
    %38 = vector.shape_cast %37 : vector<1x1x288x4xbf16> to vector<288x4xbf16>
    %c6 = arith.constant 6 : index
    %c0_42 = arith.constant 0 : index
    %c0_43 = arith.constant 0 : index
    %39 = vector.load %arg3[%c6, %c0_42, %c0_43] : memref<9x4x128xbf16, #tpu.memory_space<vmem>>, vector<1x4x128xbf16>
    %40 = vector.shape_cast %39 : vector<1x4x128xbf16> to vector<4x128xbf16>
    %cst_44 = arith.constant dense<0.000000e+00> : vector<288x128xf32>
    %41 = tpu.matmul %38, %40, %cst_44 {dimension_numbers = #tpu.dot_dimension_numbers<[1], [0], [0], [1], [0, 0, 1, 1], [], []>} : vector<288x4xbf16>, vector<4x128xbf16>, vector<288x128xf32> -> vector<288x128xf32>
    %42 = arith.addf %36, %41 : vector<288x128xf32>
    %c0_45 = arith.constant 0 : index
    %c0_46 = arith.constant 0 : index
    %c37 = arith.constant 37 : index
    %c0_47 = arith.constant 0 : index
    %43 = vector.load %arg2[%c0_45, %c0_46, %c37, %c0_47] : memref<1x1x344x4xbf16, #tpu.memory_space<vmem>>, vector<1x1x288x4xbf16>
    %44 = vector.shape_cast %43 : vector<1x1x288x4xbf16> to vector<288x4xbf16>
    %c7 = arith.constant 7 : index
    %c0_48 = arith.constant 0 : index
    %c0_49 = arith.constant 0 : index
    %45 = vector.load %arg3[%c7, %c0_48, %c0_49] : memref<9x4x128xbf16, #tpu.memory_space<vmem>>, vector<1x4x128xbf16>
    %46 = vector.shape_cast %45 : vector<1x4x128xbf16> to vector<4x128xbf16>
    %cst_50 = arith.constant dense<0.000000e+00> : vector<288x128xf32>
    %47 = tpu.matmul %44, %46, %cst_50 {dimension_numbers = #tpu.dot_dimension_numbers<[1], [0], [0], [1], [0, 0, 1, 1], [], []>} : vector<288x4xbf16>, vector<4x128xbf16>, vector<288x128xf32> -> vector<288x128xf32>
    %48 = arith.addf %42, %47 : vector<288x128xf32>
    %c0_51 = arith.constant 0 : index
    %c0_52 = arith.constant 0 : index
    %c38 = arith.constant 38 : index
    %c0_53 = arith.constant 0 : index
    %49 = vector.load %arg2[%c0_51, %c0_52, %c38, %c0_53] : memref<1x1x344x4xbf16, #tpu.memory_space<vmem>>, vector<1x1x288x4xbf16>
    %50 = vector.shape_cast %49 : vector<1x1x288x4xbf16> to vector<288x4xbf16>
    %c8 = arith.constant 8 : index
    %c0_54 = arith.constant 0 : index
    %c0_55 = arith.constant 0 : index
    %51 = vector.load %arg3[%c8, %c0_54, %c0_55] : memref<9x4x128xbf16, #tpu.memory_space<vmem>>, vector<1x4x128xbf16>
    %52 = vector.shape_cast %51 : vector<1x4x128xbf16> to vector<4x128xbf16>
    %cst_56 = arith.constant dense<0.000000e+00> : vector<288x128xf32>
    %53 = tpu.matmul %50, %52, %cst_56 {dimension_numbers = #tpu.dot_dimension_numbers<[1], [0], [0], [1], [0, 0, 1, 1], [], []>} : vector<288x4xbf16>, vector<4x128xbf16>, vector<288x128xf32> -> vector<288x128xf32>
    %54 = arith.addf %48, %53 : vector<288x128xf32>
    %c0_57 = arith.constant 0 : index
    %c0_58 = arith.constant 0 : index
    %55 = vector.load %arg5[%c0_57, %c0_58] : memref<288x128xf32, #tpu.memory_space<vmem>>, vector<288x128xf32>
    tpu.vector_store %arg5[%c0_57, %c0_58], %54 {strides = array<i32>} : memref<288x128xf32, #tpu.memory_space<vmem>>, vector<288x128xf32>,
    %c0_59 = arith.constant 0 : index
    %c0_60 = arith.constant 0 : index
    %56 = vector.load %arg4[%c0_59, %c0_60] : memref<288x1xf32, #tpu.memory_space<vmem>>, vector<288x1xf32>
    %57 = vector.broadcast %56 : vector<288x1xf32> to vector<288x128xf32>
    %58 = arith.mulf %54, %57 : vector<288x128xf32>
    %cst_61 = arith.constant dense<0.000000e+00> : vector<128xf32>
    %59 = vector.multi_reduction <add>, %58, %cst_61 [0] : vector<288x128xf32> to vector<128xf32>
    %60 = vector.shape_cast %59 : vector<128xf32> to vector<1x128xf32>
    %c0_62 = arith.constant 0 : index
    %c0_63 = arith.constant 0 : index
    %c0_64 = arith.constant 0 : index
    %c0_65 = arith.constant 0 : index
    %61 = vector.load %arg6[%c0_62, %c0_63, %c0_64, %c0_65] : memref<1x1x1x128xf32, #tpu.memory_space<vmem>>, vector<1x1x1x128xf32>
    %62 = vector.shape_cast %61 : vector<1x1x1x128xf32> to vector<1x128xf32>
    %63 = vector.shape_cast %60 : vector<1x128xf32> to vector<1x1x1x128xf32>
    tpu.vector_store %arg6[%c0_62, %c0_63, %c0_64, %c0_65], %63 {strides = array<i32>} : memref<1x1x1x128xf32, #tpu.memory_space<vmem>>, vector<1x1x1x128xf32>,
    %64 = arith.mulf %58, %58 : vector<288x128xf32>
    %cst_66 = arith.constant dense<0.000000e+00> : vector<128xf32>
    %65 = vector.multi_reduction <add>, %64, %cst_66 [0] : vector<288x128xf32> to vector<128xf32>
    %66 = vector.shape_cast %65 : vector<128xf32> to vector<1x128xf32>
    %c0_67 = arith.constant 0 : index
    %c0_68 = arith.constant 0 : index
    %c0_69 = arith.constant 0 : index
    %c0_70 = arith.constant 0 : index
    %67 = vector.load %arg7[%c0_67, %c0_68, %c0_69, %c0_70] : memref<1x1x1x128xf32, #tpu.memory_space<vmem>>, vector<1x1x1x128xf32>
    %68 = vector.shape_cast %67 : vector<1x1x1x128xf32> to vector<1x128xf32>
    %69 = vector.shape_cast %66 : vector<1x128xf32> to vector<1x1x1x128xf32>
    tpu.vector_store %arg7[%c0_67, %c0_68, %c0_69, %c0_70], %69 {strides = array<i32>} : memref<1x1x1x128xf32, #tpu.memory_space<vmem>>, vector<1x1x1x128xf32>,
    return
  }
  func.func @transform_0(%arg0: i32, %arg1: i32) -> (i32, i32, i32, i32) {
    %c0_i32 = arith.constant 0 : i32
    %c0_i32_0 = arith.constant 0 : i32
    %c0_i32_1 = arith.constant 0 : i32
    return %arg0, %arg1, %c0_i32, %c0_i32_0 : i32, i32, i32, i32
  }
  func.func @transform_1(%arg0: i32, %arg1: i32) -> (i32, i32, i32) {
    %c0_i32 = arith.constant 0 : i32
    %c0_i32_0 = arith.constant 0 : i32
    %c0_i32_1 = arith.constant 0 : i32
    %c0_i32_2 = arith.constant 0 : i32
    return %c0_i32, %c0_i32_0, %c0_i32_1 : i32, i32, i32
  }
  func.func @transform_2(%arg0: i32, %arg1: i32) -> (i32, i32) {
    %c0_i32 = arith.constant 0 : i32
    %c0_i32_0 = arith.constant 0 : i32
    %c0_i32_1 = arith.constant 0 : i32
    return %c0_i32, %c0_i32_0 : i32, i32
  }
  func.func @transform_3(%arg0: i32, %arg1: i32) -> (i32, i32) {
    %c1_i32 = arith.constant 1 : i32
    %0 = arith.muli %arg0, %c1_i32 : i32
    %1 = arith.addi %0, %arg1 : i32
    %c0_i32 = arith.constant 0 : i32
    %c0_i32_0 = arith.constant 0 : i32
    return %1, %c0_i32 : i32, i32
  }
  func.func @transform_4(%arg0: i32, %arg1: i32) -> (i32, i32, i32, i32) {
    %c0_i32 = arith.constant 0 : i32
    %c0_i32_0 = arith.constant 0 : i32
    %c0_i32_1 = arith.constant 0 : i32
    return %arg0, %arg1, %c0_i32, %c0_i32_0 : i32, i32, i32, i32
  }
  func.func @transform_5(%arg0: i32, %arg1: i32) -> (i32, i32, i32, i32) {
    %c0_i32 = arith.constant 0 : i32
    %c0_i32_0 = arith.constant 0 : i32
    %c0_i32_1 = arith.constant 0 : i32
    return %arg0, %arg1, %c0_i32, %c0_i32_0 : i32, i32, i32, i32
  }
}

</mosaic_0001>

<bundles_post_ra>
// kernel: tpu_custom_call.1
= control target key start
LH: loop header
LB: loop body
LE: loop exit
PB: predicated region body
PF: predicated region fallthrough
CT: control target
= control target key end

     0   :  { %11 = vsyncpa [#allocation3], 0  ;;  %s6921_s0 = inlined_call_operand.vmem [shape: bf16[2,1,344,4], index: 0, kind: input, shape index: {}]   ;;  %s6922_s1 = inlined_call_operand.vmem [shape: bf16[9,4,128], index: 1, kind: input, shape index: {}]   ;;  %s6923_s2 = inlined_call_operand.vmem [shape: f32[288,1], index: 2, kind: input, shape index: {}]   ;;  %s6924_s3 = inlined_call_operand.hbm [shape: f32[576,128], index: 3, kind: output, shape index: {0}]   ;;  %s6925_s4 = inlined_call_operand.hbm [shape: f32[2,1,1,128], index: 4, kind: output, shape index: {1}]   ;;  %s6926_s5 = inlined_call_operand.hbm [shape: f32[2,1,1,128], index: 5, kind: output, shape index: {2}]  }
   0x1   :  { %13 = vsyncpa [#allocation3 + $0x1], 0 }
   0x2   :  { %14 = vsyncpa [#allocation5], 0 }
   0x3   :  { %16 = vsyncpa [#allocation5 + $0x1], 0  ;;  %s5694_s18 = smov 0   ;;  %s5696_s19 = smov 0  }
   0x4   :  { %s5698_s20 = smov 0   ;;  %s5700_s21 = smov 0  }
   0x5   :  { %s5702_s22 = smov 0   ;;  %s5704_s23 = smov 0  }
   0x6 LB: > { %s4316_s24 = sadd.s32 4294967295, %s5656_s23   ;;  %s6927_s25 = sadd.s32 4294967294, %s5656_s23   ;;  %s5656_s23 = sphi %s5704_s23, %s22_s23   ;;  %s5652_s22 = sphi %s5702_s22, %s6935_s22   ;;  %s5648_s21 = sphi %s5700_s21, %s6934_s21   ;;  %s5644_s20 = sphi %s5698_s20, %s6933_s20   ;;  %s5640_s19 = sphi %s5696_s19, %s6932_s19   ;;  %s5636_s18 = sphi %s5694_s18, %s6931_s18  }
   0x7   : > { %s34_s26 = sadd.s32 1, %s5652_s22  ;;  %s113_s27 = sadd.s32 1, %s5644_s20 }
   0x8   : > { %p36_p0 = scmp.ge.s32.totalorder %s34_s26, 2  ;;  %p123_p1 = scmp.ne.s32.totalorder %s5644_s20, %s5640_s19 }
   0x9   : > { %p124_p2 = scmp.eq.s32.totalorder %s4316_s24, 1  ;;  %p129_p3 = scmp.ne.s32.totalorder %s5640_s19, %s5636_s18 }
   0xa   : > { %s6937_s26 = smov (%p36_p0, %s34_s26), 0  ;;  %p130_p5 = scmp.eq.s32.totalorder %s6927_s25, 1 }
   0xb   : > { %p5736_p4 = por %p124_p2, %p123_p1  ;;  %s110_s29 = ssub.s32 %s5652_s22, %s6937_s26 }
   0xc   : > { %p4320_p6 = scmp.ge.s32.totalorder %s5656_s23, 1  ;;  %p111_p7 = scmp.eq.s32.totalorder %s110_s29, 0 }
   0xd   : > { %p5745_p8 = por %p130_p5, %p129_p3  ;;  %p222_p9 = scmp.lt.s32.totalorder %s5656_s23, 3 }
   0xe   : > { %s5751_s6 = scalar_select %p111_p7, %s5644_s20, %s113_s27  }
   0xf   : > { %p223_p10 = pnand %p4320_p6, %p222_p9 }
  0x10   : > { %vm611_vm0 = vcmask (!%p223_p10), 1041408   ;;  %v4436_v0 = vld [vmem:[%s6922_s1 + $0x8] sm:$0x3] (!%p223_p10)  ;;  %v4322_v1 = vld [vmem:[%s6922_s1 + $0x2] sm:$0x3] (!%p223_p10)  ;;  %p262_p11 = scmp.lt.s32.totalorder (!%p223_p10), %s5648_s21, 1 }
  0x11   : > { %226 = sbr.rel (%p223_p10) target bundleno = 647 (0x287), region = 32  ;;  %5367 = vmatprep.subr.msk.bf16.mxu0 (!%p223_p10), %vm611_vm0, %v4436_v0  ;;  %5363 = vmatprep.subr.msk.bf16.mxu1 (!%p223_p10), %vm611_vm0, %v4322_v1  ;;  %v5763_v2 = vsel (!%p223_p10), %vm611_vm0, %v4436_v0, 0  ;;  %v613_v3 = vsel (!%p223_p10), %vm611_vm0, %v4322_v1, 0  ;;  %v4456_v4 = vld [vmem:[%s6922_s1 + $0xa] sm:$0x3] (!%p223_p10)  ;;  %vm556_vm2 = vcmask (!%p223_p10), 31744  }
  0x12   : > { %4884 = vmatpush3.bf16.msra.mxu0 (!%p223_p10), %v5763_v2  ;;  %4732 = vmatpush3.bf16.msra.mxu1 (!%p223_p10), %v613_v3  ;;  %v310_v5 = vld [vmem:[%s6922_s1] sm:$0x3] (!%p223_p10)  ;;  %vm407_vm1 = vsmask.f32 (!%p223_p10), 7424  ;;  %v5782_v6 = vsel (!%p223_p10), %vm611_vm0, %v4456_v4, 0  ;;  %vm2214_vm4 = vcmask (!%p223_p10), 1045504  }
  0x13   : > { %5369 = vmatprep.subr.msk.bf16.mxu0 (!%p223_p10), %vm611_vm0, %v4456_v4  ;;  %5364 = vmatprep.subr.msk.bf16.mxu1 (!%p223_p10), %vm611_vm0, %v310_v5  ;;  %vm1767_vm3 = vsmask.f32 (!%p223_p10), 6400  ;;  %v829_v12 = vsel (!%p223_p10), %vm611_vm0, %v310_v5, 0  ;;  %v5830_v39 = vld [vmem:[%s6922_s1 + $0x4] sm:$0x3] (!%p223_p10)  ;;  %vm1014_vm5 = vcmask (!%p223_p10), 1046528  }
  0x14   : > { %v5864_v1 = vld [vmem:[%s6922_s1 + $0xc] sm:$0x3] (!%p223_p10)  ;;  %vm2967_vm6 = vsmask.f32 (!%p223_p10), 5376  ;;  %vm3414_vm7 = vcmask (!%p223_p10), 1044480   ;;  %s4559_s9 = smul.u32 (!%p223_p10), 4608, %s5648_s21 }
  0x16   : > { %s6797_s13 = scalar_lea.hbm (!%p223_p10), %s6924_s3, %s4559_s9 }
  0x18   : > { %s263_s11 = scalar_select %p262_p11, %s5648_s21, 1 }
  0x1a   : > { %s5374_s16 = smul.u32 172, %s263_s11 }
  0x1c   : > { %s5779_s29 = scalar_lea.vmem %s6921_s0, %s5374_s16  ;;  %s5659_s16 = smov [#allocation2]  }
  0x1d   : > { %v274_v7 = vld [vmem:[%s5779_s29] sm:$0xf]  ;;  %v5786_v8 = vld [vmem:[%s5779_s29 + $0x4] sm:$0xf]  ;;  %v5792_v10 = vld [vmem:[%s5779_s29 + $0x8] sm:$0xff]   ;;  %s5522_s17 = sshll.u32 %s5659_s16, 4  ;;  %s5523_s17 = int_to_ptr.vmem [resolvable:$false] %s5522_s17 }
  0x1e   : > { %v5789_v9 = vcombine.low %v274_v7, %v5786_v8  ;;  %v1322_v11 = vld [vmem:[%s5779_s29 + $0x8] sm:$0xe]  ;;  %v5797_v13 = vld [vmem:[%s5779_s29 + $0xc] sm:$0xf]  ;;  %v416_v16 = vshll.u32 %v5792_v10, 16  ;;  %v420_v17 = vshrl.u32 %v5792_v10, 16 }
  0x1f   : > { %v5804_v18 = vld [vmem:[%s5779_s29 + $0x10] sm:$0xff]   ;;  %v5810_v20 = vcombine.low %v1322_v11, %v5797_v13  ;;  %v5818_v28 = vld [vmem:[%s5779_s29 + $0x18] sm:$0xff]   ;;  %v5824_v34 = vld [vmem:[%s5779_s29 + $0x20] sm:$0xff]   ;;  %s5524_s27 = scalar_lea.vmem %s5523_s17, 9216 }
  0x20   : > { %v409_v14 = vshrl.u32 %v5789_v9, 16  ;;  %v411_v15 = vshll.u32 %v5789_v9, 16  ;;  %v5807_v19 = vld [vmem:[%s5779_s29 + $0x10] sm:$0xff]   ;;  %v418_v22 = vrot.slane %v416_v16, 1  ;;  %v1777_v23 = vshrl.u32 %v5804_v18, 16  ;;  %v5821_v33 = vld [vmem:[%s5779_s29 + $0x18] sm:$0xff]  }
  0x21   : > { %v1780_v24 = vshll.u32 %v5804_v18, 16  ;;  %v1769_v25 = vshrl.u32 %v5810_v20, 16  ;;  %v1772_v26 = vshll.u32 %v5810_v20, 16  ;;  %v424_v27 = vshll.u32 %v5807_v19, 16  ;;  %v5839_v48 = vld [vmem:[%s5779_s29 + $0x20] sm:$0xff]   ;;  %v5842_v49 = vld [vmem:[%s5779_s29 + $0x28] sm:$0xff]  }
  0x22   : > { %v413_v21 = vrot.slane %v411_v15, 1  ;;  %v422_v30 = vor.u32 %v420_v17, %v418_v22  ;;  %v1779_v31 = vrot.slane %v1777_v23, 1  ;;  %v1786_v38 = vshrl.u32 %v5818_v28, 16  ;;  %v5848_v54 = vld [vmem:[%s5779_s29 + $0x28] sm:$0xff]   ;;  %v5854_v59 = vld [vmem:[%s5779_s29 + $0x30] sm:$0xff]   ;;  %v5878_v23 = vld [vmem:[%s5779_s29 + $0x38] sm:$0xff]  }
  0x23   : > { %v1782_v32 = vrot.slane %v1780_v24, 2  ;;  %v1771_v35 = vrot.slane %v1769_v25, 1  ;;  %v1774_v36 = vrot.slane %v1772_v26, 2  ;;  %v426_v37 = vrot.slane %v424_v27, 1  ;;  %v5859_v0 = vld [vmem:[%s5779_s29 + $0x30] sm:$0xff]  }
  0x24   : > { %v414_v29 = vor.u32 %v413_v21, %v409_v14  ;;  %v1789_v42 = vshll.u32 %v5818_v28, 16  ;;  %v428_v43 = vshrl.u32 %v5807_v19, 16  ;;  %v1788_v46 = vrot.slane %v1786_v38, 1 }
  0x25   : > { %v1783_v41 = vor.u32 %v1782_v32, %v1779_v31  ;;  %v1775_v44 = vor.u32 %v1774_v36, %v1771_v35  ;;  %v427_v45 = vsel %vm407_vm1, %v422_v30, %v426_v37  ;;  %v432_v47 = vshll.u32 %v5821_v33, 16  ;;  %v5887_v35 = vld [vmem:[%s5779_s29 + $0x38] sm:$0xff]  }
  0x26   : > { %v419_v40 = vsel %vm407_vm1, %v414_v29, %v418_v22  ;;  %v1791_v50 = vrot.slane %v1789_v42, 2  ;;  %v430_v51 = vor.u32 %v428_v43, %v426_v37  ;;  %v1795_v52 = vshrl.u32 %v5824_v34, 16 }
  0x27   : > { %4733 = vmatprep.mubr.msk.bf16.mxu1 %vm556_vm2, %v419_v40  ;;  %v1798_v53 = vshll.u32 %v5824_v34, 16  ;;  %v1784_v55 = vsel %vm1767_vm3, %v1775_v44, %v1783_v41  ;;  %v434_v56 = vrot.slane %v432_v47, 1  ;;  %v436_v57 = vshrl.u32 %v5821_v33, 16  ;;  %v5898_v44 = vld [vmem:[%s5779_s29 + $0x40] sm:$0xff]  }
  0x28   : > { %4734 = vmatmul.mubr.msk.bf16.vlgmr.msra.gmra.mrb[0].mxu1 %vm556_vm2, %v427_v45  ;;  %v440_v58 = vshll.u32 %v5839_v48, 16  ;;  %4885 = vmatprep.mubr.msk.bf16.mxu0 %vm556_vm2, %v1784_v55  ;;  %v1792_v60 = vor.u32 %v1791_v50, %v1788_v46  ;;  %v1797_v61 = vrot.slane %v1795_v52, 1  ;;  %v1804_v63 = vshrl.u32 %v5842_v49, 16 }
  0x29   : > { %4770 = vmatpush3.bf16.msra.mxu1 %v829_v12  ;;  %v1800_v62 = vrot.slane %v1798_v53, 2  ;;  %v435_v3 = vsel %vm407_vm1, %v430_v51, %v434_v56  ;;  %v438_v4 = vor.u32 %v436_v57, %v434_v56  ;;  %v1807_v7 = vshll.u32 %v5842_v49, 16  ;;  %v5903_v51 = vld [vmem:[%s5779_s29 + $0x40] sm:$0xff]  }
  0x2a   : > { %5365 = vmatprep.subr.msk.bf16.mxu1 %vm611_vm0, %v5830_v39  ;;  %v442_v5 = vrot.slane %v440_v58, 1  ;;  %v1793_v11 = vsel %vm1767_vm3, %v1783_v41, %v1792_v60  ;;  %4737 = vmatprep.mubr.msk.bf16.mxu1 %vm556_vm2, %v435_v3  ;;  %v1806_v14 = vrot.slane %v1804_v63, 1  ;;  %v444_v15 = vshrl.u32 %v5839_v48, 16  ;;  %v5914_v63 = vld [vmem:[%s5779_s29 + $0x48] sm:$0xff]  }
  0x2b   : > { %v1801_v12 = vor.u32 %v1800_v62, %v1797_v61  ;;  %4886 = vmatmul.mubr.msk.bf16.vlgmr.msra.gmra.mrb[0].mxu0 %vm556_vm2, %v1793_v11  ;;  %v1809_v17 = vrot.slane %v1807_v7, 2  ;;  %v448_v21 = vshll.u32 %v5848_v54, 16  ;;  %v1813_v22 = vshrl.u32 %v5854_v59, 16  ;;  %v5911_v62 = vld [vmem:[%s5779_s29 + $0x48] sm:$0xff]  }
  0x2c   : > { %v443_v16 = vsel %vm407_vm1, %v438_v4, %v442_v5  ;;  %4922 = vmatpush3.bf16.msra.mxu0 %v5782_v6  ;;  %v446_v25 = vor.u32 %v444_v15, %v442_v5  ;;  %v1816_v26 = vshll.u32 %v5854_v59, 16  ;;  %v452_v27 = vshrl.u32 %v5848_v54, 16 }
  0x2d   : > { %v1802_v24 = vsel %vm1767_vm3, %v1792_v60, %v1801_v12  ;;  %v1810_v29 = vor.u32 %v1809_v17, %v1806_v14  ;;  %v450_v30 = vrot.slane %v448_v21, 1  ;;  %v1815_v31 = vrot.slane %v1813_v22, 1  ;;  %5370 = vmatprep.subr.msk.bf16.mxu0 %vm611_vm0, %v5864_v1  ;;  %v5923_v14 = vld [vmem:[%s5779_s29 + $0x50] sm:$0xff]  }
  0x2e   : > { %4889 = vmatprep.mubr.msk.bf16.mxu0 %vm556_vm2, %v1802_v24  ;;  %v456_v32 = vshll.u32 %v5859_v0, 16  ;;  %v1818_v6 = vrot.slane %v1816_v26, 2  ;;  %v1822_v36 = vshrl.u32 %v5878_v23, 16  ;;  %v1825_v37 = vshll.u32 %v5878_v23, 16 }
  0x2f   : > { %v460_v38 = vshrl.u32 %v5859_v0, 16  ;;  %v1811_v40 = vsel %vm1767_vm3, %v1801_v12, %v1810_v29  ;;  %v451_v41 = vsel %vm407_vm1, %v446_v25, %v450_v30  ;;  %v454_v42 = vor.u32 %v452_v27, %v450_v30  ;;  %v5931_v25 = vld [vmem:[%s5779_s29 + $0x50] sm:$0xff]  }
  0x30   : > { %4738 = vmatmul.mubr.msk.bf16.gmra.mrb[4].mxu1 %vm556_vm2, %v443_v16  ;;  %v458_v43 = vrot.slane %v456_v32, 1  ;;  %v1819_v45 = vor.u32 %v1818_v6, %v1815_v31  ;;  %v1824_v46 = vrot.slane %v1822_v36, 1  ;;  %v1827_v47 = vrot.slane %v1825_v37, 2 }
  0x31   : > { %4741 = vmatprep.mubr.msk.bf16.mxu1 %vm556_vm2, %v451_v41  ;;  %v464_v50 = vshll.u32 %v5887_v35, 16  ;;  %v1831_v55 = vshrl.u32 %v5898_v44, 16  ;;  %v1834_v56 = vshll.u32 %v5898_v44, 16  ;;  %v468_v61 = vshrl.u32 %v5887_v35, 16  ;;  %v5941_v41 = vld [vmem:[%s5779_s29 + $0x58] sm:$0xff]  }
  0x32   : > { %v459_v52 = vsel %vm407_vm1, %v454_v42, %v458_v43  ;;  %v462_v53 = vor.u32 %v460_v38, %v458_v43  ;;  %v1820_v57 = vsel %vm1767_vm3, %v1810_v29, %v1819_v45  ;;  %v1828_v58 = vor.u32 %v1827_v47, %v1824_v46  ;;  %v5936_v29 = vld [vmem:[%s5779_s29 + $0x58] sm:$0xff]  }
  0x33   : > { %v466_v60 = vrot.slane %v464_v50, 1  ;;  %4890 = vmatmul.mubr.msk.bf16.gmra.mrb[4].mxu0 %vm556_vm2, %v1811_v40  ;;  %v1833_v3 = vrot.slane %v1831_v55, 1  ;;  %v1836_v4 = vrot.slane %v1834_v56, 2  ;;  %v472_v5 = vshll.u32 %v5903_v51, 16 }
  0x34   : > { %v476_v7 = vshrl.u32 %v5903_v51, 16  ;;  %4893 = vmatprep.mubr.msk.bf16.mxu0 %vm556_vm2, %v1820_v57  ;;  %v1840_v12 = vshrl.u32 %v5911_v62, 16  ;;  %v1843_v16 = vshll.u32 %v5911_v62, 16  ;;  %v480_v17 = vshll.u32 %v5914_v63, 16  ;;  %v2208_v57 = vld [vmem:[%s5779_s29 + $0x8] sm:$0xc] }
  0x35   : > { %v467_v11 = vsel %vm407_vm1, %v462_v53, %v466_v60  ;;  %v1837_v15 = vor.u32 %v1836_v4, %v1833_v3  ;;  %v474_v21 = vrot.slane %v472_v5, 1  ;;  %v1849_v22 = vshrl.u32 %v5923_v14, 16 }
  0x36   : > { %v1852_v24 = vshll.u32 %v5923_v14, 16  ;;  %v1829_v26 = vsel %vm1767_vm3, %v1819_v45, %v1828_v58  ;;  %v470_v27 = vor.u32 %v468_v61, %v466_v60  ;;  %v1842_v30 = vrot.slane %v1840_v12, 1 }
  0x37   : > { %v1845_v31 = vrot.slane %v1843_v16, 2  ;;  %v478_v32 = vor.u32 %v476_v7, %v474_v21  ;;  %v482_v6 = vrot.slane %v480_v17, 1  ;;  %v1838_v36 = vsel %vm1767_vm3, %v1828_v58, %v1837_v15  ;;  %v5955_v58 = vld [vmem:[%s5779_s29 + $0x60] sm:$0xff]  }
  0x38   : > { %4742 = vmatmul.mubr.msk.bf16.gmra.mrb[8].mxu1 %vm556_vm2, %v459_v52  ;;  %v1851_v37 = vrot.slane %v1849_v22, 1  ;;  %v1854_v38 = vrot.slane %v1852_v24, 2  ;;  %v488_v40 = vshll.u32 %v5931_v25, 16  ;;  %v475_v42 = vsel %vm407_vm1, %v470_v27, %v474_v21 }
  0x39   : > { %4745 = vmatprep.mubr.msk.bf16.mxu1 %vm556_vm2, %v467_v11  ;;  %v484_v43 = vshrl.u32 %v5914_v63, 16  ;;  %v1858_v45 = vshrl.u32 %v5936_v29, 16  ;;  %v1861_v46 = vshll.u32 %v5936_v29, 16  ;;  %v1846_v47 = vor.u32 %v1845_v31, %v1842_v30  ;;  %v5960_v11 = vld [vmem:[%s5779_s29 + $0x68] sm:$0xff]  }
  0x3a   : > { %v483_v50 = vsel %vm407_vm1, %v478_v32, %v482_v6  ;;  %v492_v52 = vshrl.u32 %v5931_v25, 16  ;;  %v496_v53 = vshll.u32 %v5941_v41, 16  ;;  %v1855_v55 = vor.u32 %v1854_v38, %v1851_v37  ;;  %v5977_v32 = vld [vmem:[%s5779_s29 + $0x70] sm:$0xff]  }
  0x3b   : > { %4894 = vmatmul.mubr.msk.bf16.gmra.mrb[8].mxu0 %vm556_vm2, %v1829_v26  ;;  %v490_v56 = vrot.slane %v488_v40, 1  ;;  %v486_v60 = vor.u32 %v484_v43, %v482_v6  ;;  %v1860_v61 = vrot.slane %v1858_v45, 1  ;;  %v1863_v3 = vrot.slane %v1861_v46, 2  ;;  %v5983_v40 = vld [vmem:[%s5779_s29 + $0x78] sm:$0xff]  }
  0x3c   : > { %4897 = vmatprep.mubr.msk.bf16.mxu0 %vm556_vm2, %v1838_v36  ;;  %v1847_v4 = vsel %vm1767_vm3, %v1837_v15, %v1846_v47  ;;  %v498_v7 = vrot.slane %v496_v53, 1  ;;  %v1856_v12 = vsel %vm1767_vm3, %v1846_v47, %v1855_v55  ;;  %v4457_v16 = vcombine.low %v2208_v57, %v5797_v13 }
  0x3d   : > { %v494_v5 = vor.u32 %v492_v52, %v490_v56  ;;  %v504_v17 = vshll.u32 %v5955_v58, 16  ;;  %v491_v21 = vsel %vm407_vm1, %v486_v60, %v490_v56  ;;  %v500_v22 = vshrl.u32 %v5941_v41, 16  ;;  %v5998_v56 = vld [vmem:[%s5779_s29 + $0x80] sm:$0xff]  }
  0x3e   : > { %v5969_v15 = vor.u32 %v1863_v3, %v1860_v61  ;;  %v508_v26 = vshrl.u32 %v5955_v58, 16  ;;  %v512_v27 = vshll.u32 %v5960_v11, 16  ;;  %v2215_v13 = vrot.slane %v4457_v16, 2 }
  0x3f   : > { %v499_v24 = vsel %vm407_vm1, %v494_v5, %v498_v7  ;;  %v2216_v30 = vrot.slane %v5804_v18, 2  ;;  %v506_v31 = vrot.slane %v504_v17, 1  ;;  %v502_v6 = vor.u32 %v500_v22, %v498_v7 }
  0x40   : > { %4746 = vmatmul.mubr.msk.bf16.gmra.mrb[12].mxu1 %vm556_vm2, %v475_v42  ;;  %v1865_v36 = vsel %vm1767_vm3, %v1855_v55, %v5969_v15  ;;  %v514_v38 = vrot.slane %v512_v27, 1  ;;  %v520_v18 = vshll.u32 %v5977_v32, 16  ;;  %v2218_v45 = vrot.slane %v5818_v28, 2  ;;  %v6028_v27 = vld [vmem:[%s5779_s29 + $0x90] ss:$0 sps:$4 sm:$0x11]  }
  0x41   : > { %4749 = vmatprep.mubr.msk.bf16.mxu1 %vm556_vm2, %v483_v50  ;;  %v510_v37 = vor.u32 %v508_v26, %v506_v31  ;;  %v2217_v42 = vsel %vm2214_vm4, %v2215_v13, %v2216_v30  ;;  %v507_v43 = vsel %vm407_vm1, %v502_v6, %v506_v31  ;;  %v516_v46 = vshrl.u32 %v5960_v11, 16 }
  0x42   : > { %v524_v50 = vshrl.u32 %v5977_v32, 16  ;;  %v528_v52 = vshll.u32 %v5983_v40, 16  ;;  %v2220_v53 = vrot.slane %v5824_v34, 2  ;;  %v522_v55 = vrot.slane %v520_v18, 1  ;;  %v6011_v34 = vld [vmem:[%s6922_s1 + $0xe] sm:$0x3] }
  0x43   : > { %4898 = vmatmul.mubr.msk.bf16.gmra.mrb[12].mxu0 %vm556_vm2, %v1847_v4  ;;  %v515_v47 = vsel %vm407_vm1, %v510_v37, %v514_v38  ;;  %v2746_v28 = vsel %vm611_vm0, %v5864_v1, 0  ;;  %v518_v57 = vor.u32 %v516_v46, %v514_v38  ;;  %v2219_v60 = vsel %vm2214_vm4, %v2216_v30, %v2218_v45  ;;  %v6005_v4 = vld [vmem:[%s5779_s29 + $0x88] sm:$0xff]  }
  0x44   : > { %4901 = vmatprep.mubr.msk.bf16.mxu0 %vm556_vm2, %v1856_v12  ;;  %v526_v61 = vor.u32 %v524_v50, %v522_v55  ;;  %v530_v3 = vrot.slane %v528_v52, 1  ;;  %v2221_v5 = vsel %vm2214_vm4, %v2218_v45, %v2220_v53  ;;  %v536_v7 = vshll.u32 %v5998_v56, 16 }
  0x45   : > { %v523_v1 = vsel %vm407_vm1, %v518_v57, %v522_v55  ;;  %v2222_v12 = vrot.slane %v5842_v49, 2  ;;  %v532_v16 = vshrl.u32 %v5983_v40, 16  ;;  %v544_v22 = vshll.u32 %v6005_v4, 16  ;;  %v6055_v55 = vld [vmem:[%s5779_s29 + $0x60] sm:$0xff]   ;;  %v6074_v57 = vld [vmem:[%s5779_s29 + $0x68] sm:$0xff]  }
  0x46   : > { %v531_v17 = vsel %vm407_vm1, %v526_v61, %v530_v3  ;;  %v538_v26 = vrot.slane %v536_v7, 1  ;;  %v552_v37 = vshll.u32 %v6028_v27, 16  ;;  %v2226_v38 = vrot.slane %v5878_v23, 2  ;;  %v6092_v7 = vld [vmem:[%s5779_s29 + $0x78] sm:$0xff]  }
  0x47   : > { %v534_v49 = vor.u32 %v532_v16, %v530_v3  ;;  %v2223_v13 = vsel %vm2214_vm4, %v2220_v53, %v2222_v12  ;;  %v546_v31 = vrot.slane %v544_v22, 1  ;;  %v2228_v18 = vrot.slane %v5898_v44, 2  ;;  %v6108_v22 = vld [vmem:[%s5779_s29 + $0x88] sm:$0xff]  }
  0x48   : > { %4750 = vmatmul.mubr.msk.bf16.gmra.mrb[16].mxu1 %vm556_vm2, %v491_v21  ;;  %v540_v21 = vshrl.u32 %v5998_v56, 16  ;;  %v554_v45 = vrot.slane %v552_v37, 1  ;;  %v2230_v23 = vrot.slane %v5911_v62, 2  ;;  %v2232_v44 = vrot.slane %v5923_v14, 2 }
  0x49   : > { %4753 = vmatprep.mubr.msk.bf16.mxu1 %vm556_vm2, %v499_v24  ;;  %v2224_v24 = vrot.slane %v5854_v59, 2  ;;  %v539_v59 = vsel %vm407_vm1, %v534_v49, %v538_v26  ;;  %v2234_v62 = vrot.slane %v5936_v29, 2  ;;  %v1107_v14 = vsel %vm611_vm0, %v5830_v39, 0 }
  0x4a   : > { %v542_v30 = vor.u32 %v540_v21, %v538_v26  ;;  %v2231_v52 = vsel %vm2214_vm4, %v2228_v18, %v2230_v23  ;;  %v2233_v53 = vsel %vm2214_vm4, %v2230_v23, %v2232_v44  ;;  %v2238_v61 = vrot.slane %v6074_v57, 2  ;;  %v6112_v26 = vld [vmem:[%s5779_s29 + $0x90] sm:$0xff]  }
  0x4b   : > { %4902 = vmatmul.mubr.msk.bf16.gmra.mrb[16].mxu0 %vm556_vm2, %v1865_v36  ;;  %v2225_v6 = vsel %vm2214_vm4, %v2222_v12, %v2224_v24  ;;  %v548_v36 = vshrl.u32 %v6005_v4, 16  ;;  %v2227_v46 = vsel %vm2214_vm4, %v2224_v24, %v2226_v38  ;;  %v2235_v29 = vsel %vm2214_vm4, %v2232_v44, %v2234_v62  ;;  %v6096_v12 = vld [vmem:[%s5779_s29 + $0x80] sm:$0xff]  }
  0x4c   : > { %4923 = vmatprep.mubr.msk.bf16.mxu0 %vm556_vm2, %v2217_v42  ;;  %v547_v42 = vsel %vm407_vm1, %v542_v30, %v546_v31  ;;  %v2242_v16 = vrot.slane %v6092_v7, 2  ;;  %v2246_v49 = vrot.slane %v6108_v22, 2  ;;  %v2522_v30 = vld [vmem:[%s5779_s29 + $0x10] sm:$0xc] }
  0x50   : > { %4754 = vmatmul.mubr.msk.bf16.gmra.mrb[20].mxu1 %vm556_vm2, %v507_v43  ;;  %v550_v43 = vor.u32 %v548_v36, %v546_v31  ;;  %v6122_v31 = vld [vmem:[%s5779_s29 + $0x14] sm:$0xf] }
  0x51   : > { %4757 = vmatprep.mubr.msk.bf16.mxu1 %vm556_vm2, %v515_v47  ;;  %v2229_v47 = vsel %vm2214_vm4, %v2226_v38, %v2228_v18  ;;  %v6132_v37 = vcombine.low %v2522_v30, %v6122_v31  ;;  %v6135_v38 = vld [vmem:[%s5779_s29 + $0x18] sm:$0xff]  }
  0x52   : > { %v555_v50 = vsel %vm407_vm1, %v550_v43, %v554_v45  ;;  %v2655_v43 = vrot.slane %v6135_v38, 2 }
  0x53   : > { %4924 = vmatmul.mubr.msk.bf16.vlgmr.msra.gmra.mrb[0].mxu0 %vm556_vm2, %v2219_v60  ;;  %v6080_v60 = vld [vmem:[%s5779_s29 + $0x70] sm:$0xff]   ;;  %v2654_v18 = vrot.slane %v6132_v37, 2 }
  0x54   : > { %4960 = vmatpush3.bf16.msra.mxu0 %v2746_v28  ;;  %4927 = vmatprep.mubr.msk.bf16.mxu0 %vm556_vm2, %v2221_v5  ;;  %v2236_v28 = vrot.slane %v6055_v55, 2  ;;  %v2240_v3 = vrot.slane %v6080_v60, 2 }
  0x55   : > { %5371 = vmatprep.subr.msk.bf16.mxu0 %vm611_vm0, %v6011_v34 }
  0x56   : > { %v2237_v39 = vsel %vm2214_vm4, %v2234_v62, %v2236_v28  ;;  %v2239_v5 = vsel %vm2214_vm4, %v2236_v28, %v2238_v61  ;;  %v2243_v21 = vsel %vm2214_vm4, %v2240_v3, %v2242_v16  ;;  %v3193_v62 = vsel %vm611_vm0, %v6011_v34, 0  ;;  %v6170_v28 = vld [vmem:[%s5779_s29 + $0x38] sm:$0xff]  }
  0x58   : > { %4758 = vmatmul.mubr.msk.bf16.gmra.mrb[24].mxu1 %vm556_vm2, %v523_v1  ;;  %v2241_v1 = vsel %vm2214_vm4, %v2238_v61, %v2240_v3  ;;  %v2663_v61 = vrot.slane %v6170_v28, 2  ;;  %v6189_v3 = vld [vmem:[%s5779_s29 + $0x40] sm:$0xff]  }
  0x59   : > { %4761 = vmatprep.mubr.msk.bf16.mxu1 %vm556_vm2, %v531_v17  ;;  %v2244_v17 = vrot.slane %v6096_v12, 2 }
  0x5b   : > { %4928 = vmatmul.mubr.msk.bf16.gmra.mrb[4].mxu0 %vm556_vm2, %v2223_v13  ;;  %v2245_v24 = vsel %vm2214_vm4, %v2242_v16, %v2244_v17  ;;  %v2248_v13 = vrot.slane %v6112_v26, 2  ;;  %v1008_v16 = vld [vmem:[%s5779_s29] sm:$0xe] }
  0x5c   : > { %4931 = vmatprep.mubr.msk.bf16.mxu0 %vm556_vm2, %v2225_v6  ;;  %v2247_v6 = vsel %vm2214_vm4, %v2244_v17, %v2246_v49  ;;  %v2665_v17 = vrot.slane %v6189_v3, 2 }
  0x5d   : > { %v2249_v36 = vsel %vm2214_vm4, %v2246_v49, %v2248_v13 }
  0x5e   : > { %v2666_v49 = vsel %vm2214_vm4, %v2663_v61, %v2665_v17 }
  0x60   : > { %4762 = vmatmul.mubr.msk.bf16.gmra.mrb[28].mxu1 %vm556_vm2, %v539_v59  ;;  %v6128_v59 = vld [vmem:[%s5779_s29 + $0x98] ss:$0 sps:$4 sm:$0x33]  }
  0x61   : > { %4765 = vmatprep.mubr.msk.bf16.mxu1 %vm556_vm2, %v547_v42  ;;  %v2250_v42 = vrot.slane %v6128_v59, 2 }
  0x63   : > { %4932 = vmatmul.mubr.msk.bf16.gmra.mrb[8].mxu0 %vm556_vm2, %v2227_v46  ;;  %v2251_v45 = vsel %vm2214_vm4, %v2248_v13, %v2250_v42  ;;  %v6148_v46 = vld [vmem:[%s5779_s29 + $0x20] sm:$0xff]   ;;  %v6207_v13 = vld [vmem:[%s5779_s29 + $0x50] sm:$0xff]  }
  0x64   : > { %4935 = vmatprep.mubr.msk.bf16.mxu0 %vm556_vm2, %v2229_v47  ;;  %v2656_v47 = vsel %vm2214_vm4, %v2654_v18, %v2655_v43  ;;  %v2657_v23 = vrot.slane %v6148_v46, 2  ;;  %v2669_v42 = vrot.slane %v6207_v13, 2 }
  0x68   : > { %4766 = vmatmul.mubr.msk.bf16.gmra.mrb[32].mxu1 %vm556_vm2, %v555_v50  ;;  %v6152_v50 = vld [vmem:[%s5779_s29 + $0x28] sm:$0xff]  }
  0x69   : > { %4771 = vmatprep.mubr.msk.bf16.mxu1 %vm556_vm2, %v5789_v9  ;;  %v6066_v9 = vld [vmem:[%s6922_s1 + $0x6] sm:$0x3]  ;;  %v2659_v44 = vrot.slane %v6152_v50, 2 }
  0x6b   : > { %4936 = vmatmul.mubr.msk.bf16.gmra.mrb[12].mxu0 %vm556_vm2, %v2231_v52  ;;  %v2658_v52 = vsel %vm2214_vm4, %v2655_v43, %v2657_v23 }
  0x6c   : > { %4939 = vmatprep.mubr.msk.bf16.mxu0 %vm556_vm2, %v2233_v53  ;;  %v6164_v53 = vld [vmem:[%s5779_s29 + $0x30] sm:$0xff]  }
  0x70   : > { %4772 = vmatmul.mubr.msk.bf16.vlgmr.msra.gmra.mrb[0].mxu1 %vm556_vm2, %v5792_v10 }
  0x71   : > { %4775 = vmatprep.mubr.msk.bf16.mxu1 %vm556_vm2, %v5807_v19  ;;  %4808 = vmatpush3.bf16.msra.mxu1 %v1107_v14  ;;  %v2660_v14 = vsel %vm2214_vm4, %v2657_v23, %v2659_v44  ;;  %v1020_v23 = vrot.slane %v5821_v33, 1 }
  0x72   : > { %5366 = vmatprep.subr.msk.bf16.mxu1 %vm611_vm0, %v6066_v9 }
  0x73   : > { %4940 = vmatmul.mubr.msk.bf16.gmra.mrb[16].mxu0 %vm556_vm2, %v2235_v29  ;;  %v6175_v29 = vld [vmem:[%s6922_s1 + $0x10] sm:$0x3] }
  0x74   : > { %4943 = vmatprep.mubr.msk.bf16.mxu0 %vm556_vm2, %v2237_v39  ;;  %v2661_v39 = vrot.slane %v6164_v53, 2 }
  0x76   : > { %v2662_v34 = vsel %vm2214_vm4, %v2659_v44, %v2661_v39 }
  0x78   : > { %4776 = vmatmul.mubr.msk.bf16.gmra.mrb[4].mxu1 %vm556_vm2, %v5821_v33 }
  0x79   : > { %4779 = vmatprep.mubr.msk.bf16.mxu1 %vm556_vm2, %v5839_v48 }
  0x7b   : > { %4944 = vmatmul.mubr.msk.bf16.gmra.mrb[20].mxu0 %vm556_vm2, %v2239_v5  ;;  %v2664_v5 = vsel %vm2214_vm4, %v2661_v39, %v2663_v61  ;;  %v1546_v39 = vsel %vm611_vm0, %v6066_v9, 0  ;;  %v5658_v61 = vmov 0   ;;  %v5507_v9 = vld [vmem:[%s6922_s1 + $0x8] sm:$0x3] }
  0x7c   : > { %4947 = vmatprep.mubr.msk.bf16.mxu0 %vm556_vm2, %v2241_v1  ;;  %v6193_v1 = vld [vmem:[%s5779_s29 + $0x48] sm:$0xff]   ;;  %5443 = vset.pattern.permute.xlu0 %v5658_v61 }
  0x7d   : > { %5444 = vset.pattern.permute.xlu1 %v5658_v61  ;;  %v3764_v61 = vld [vmem:[%s6923_s2 + $0x30] sm:$0xff] }
  0x80   : > { %4780 = vmatmul.mubr.msk.bf16.gmra.mrb[8].mxu1 %vm556_vm2, %v5848_v54 }
  0x81   : > { %4783 = vmatprep.mubr.msk.bf16.mxu1 %vm556_vm2, %v5859_v0 }
  0x83   : > { %4948 = vmatmul.mubr.msk.bf16.gmra.mrb[24].mxu0 %vm556_vm2, %v2243_v21  ;;  %v4379_v21 = vcombine.low %v1008_v16, %v5786_v8  ;;  %v6212_v8 = vld [vmem:[%s5779_s29 + $0x58] sm:$0xff]   ;;  %v6245_v16 = vld [vmem:[%s5779_s29 + $0x70] sm:$0xff]  }
  0x84   : > { %4951 = vmatprep.mubr.msk.bf16.mxu0 %vm556_vm2, %v2245_v24  ;;  %v2667_v24 = vrot.slane %v6193_v1, 2  ;;  %v2671_v43 = vrot.slane %v6212_v8, 2 }
  0x85   : > { %v1015_v30 = vrot.slane %v4379_v21, 1 }
  0x86   : > { %v2672_v44 = vsel %vm2214_vm4, %v2669_v42, %v2671_v43 }
  0x88   : > { %4784 = vmatmul.mubr.msk.bf16.gmra.mrb[12].mxu1 %vm556_vm2, %v5887_v35 }
  0x89   : > { %4787 = vmatprep.mubr.msk.bf16.mxu1 %vm556_vm2, %v5903_v51 }
  0x8b   : > { %4952 = vmatmul.mubr.msk.bf16.gmra.mrb[28].mxu0 %vm556_vm2, %v2247_v6  ;;  %v1016_v6 = vrot.slane %v5792_v10, 1  ;;  %v1018_v10 = vrot.slane %v5807_v19, 1 }
  0x8c   : > { %4955 = vmatprep.mubr.msk.bf16.mxu0 %vm556_vm2, %v2249_v36  ;;  %v2668_v36 = vsel %vm2214_vm4, %v2665_v17, %v2667_v24  ;;  %v1024_v17 = vrot.slane %v5848_v54, 1  ;;  %v3760_v54 = vld [vmem:[%s6923_s2 + $0x10] sm:$0xff] }
  0x8d   : > { %v1017_v18 = vsel %vm1014_vm5, %v1015_v30, %v1016_v6  ;;  %v1021_v19 = vsel %vm1014_vm5, %v1018_v10, %v1020_v23  ;;  %v2677_v30 = vrot.slane %v6245_v16, 2  ;;  %3806 = vperm.xlu1 %5444, %v3760_v54   ;;  %v3766_v54 = vld [vmem:[%s6923_s2 + $0x40] sm:$0xff] }
  0x90   : > { %4788 = vmatmul.mubr.msk.bf16.gmra.mrb[16].mxu1 %vm556_vm2, %v5914_v63 }
  0x91   : > { %4791 = vmatprep.mubr.msk.bf16.mxu1 %vm556_vm2, %v5931_v25 }
  0x93   : > { %4956 = vmatmul.mubr.msk.bf16.gmra.mrb[32].mxu0 %vm556_vm2, %v2251_v45  ;;  %v2670_v45 = vsel %vm2214_vm4, %v2667_v24, %v2669_v42  ;;  %v6254_v24 = vld [vmem:[%s5779_s29 + $0x78] sm:$0xff]   ;;  %v3759_v42 = vld [vmem:[%s6923_s2 + $0x8] sm:$0xff] }
  0x94   : > { %4961 = vmatprep.mubr.msk.bf16.mxu0 %vm556_vm2, %v2656_v47  ;;  %v6225_v47 = vld [vmem:[%s5779_s29 + $0x60] sm:$0xff]  }
  0x98   : > { %4792 = vmatmul.mubr.msk.bf16.gmra.mrb[20].mxu1 %vm556_vm2, %v5941_v41 }
  0x99   : > { %4795 = vmatprep.mubr.msk.bf16.mxu1 %vm556_vm2, %v5955_v58 }
  0x9b   : > { %4962 = vmatmul.mubr.msk.bf16.vlgmr.msra.gmra.mrb[0].mxu0 %vm556_vm2, %v2658_v52  ;;  %v6230_v52 = vld [vmem:[%s5779_s29 + $0x68] sm:$0xff]  }
  0x9c   : > { %4998 = vmatpush3.bf16.msra.mxu0 %v3193_v62  ;;  %4965 = vmatprep.mubr.msk.bf16.mxu0 %vm556_vm2, %v2660_v14  ;;  %v1019_v62 = vsel %vm1014_vm5, %v1016_v6, %v1018_v10  ;;  %v2673_v14 = vrot.slane %v6225_v47, 2  ;;  %v2675_v33 = vrot.slane %v6230_v52, 2  ;;  %v6276_v10 = vld [vmem:[%s5779_s29 + $0x80] sm:$0xff]  }
  0x9d   : > { %5372 = vmatprep.subr.msk.bf16.mxu0 %vm611_vm0, %v6175_v29 }
  0x9e   : > { %v2676_v21 = vsel %vm2214_vm4, %v2673_v14, %v2675_v33 }
  0xa0   : > { %4796 = vmatmul.mubr.msk.bf16.gmra.mrb[24].mxu1 %vm556_vm2, %v5960_v11 }
  0xa1   : > { %4799 = vmatprep.mubr.msk.bf16.mxu1 %vm556_vm2, %v5977_v32 }
  0xa3   : > { %4966 = vmatmul.mubr.msk.bf16.gmra.mrb[4].mxu0 %vm556_vm2, %v2662_v34  ;;  %v1022_v34 = vrot.slane %v5839_v48, 1 }
  0xa4   : > { %4969 = vmatprep.mubr.msk.bf16.mxu0 %vm556_vm2, %v2664_v5  ;;  %v2674_v5 = vsel %vm2214_vm4, %v2671_v43, %v2673_v14  ;;  %v2678_v43 = vsel %vm2214_vm4, %v2675_v33, %v2677_v30  ;;  %v3762_v14 = vld [vmem:[%s6923_s2 + $0x20] sm:$0xff]  ;;  %v3763_v33 = vld [vmem:[%s6923_s2 + $0x28] sm:$0xff] }
  0xa5   : > { %v1023_v48 = vsel %vm1014_vm5, %v1020_v23, %v1022_v34  ;;  %v1025_v6 = vsel %vm1014_vm5, %v1022_v34, %v1024_v17  ;;  %v1030_v34 = vrot.slane %v5903_v51, 1  ;;  %v3765_v51 = vld [vmem:[%s6923_s2 + $0x38] sm:$0xff] }
  0xa8   : > { %4800 = vmatmul.mubr.msk.bf16.gmra.mrb[28].mxu1 %vm556_vm2, %v5983_v40 }
  0xa9   : > { %4803 = vmatprep.mubr.msk.bf16.mxu1 %vm556_vm2, %v5998_v56 }
  0xab   : > { %4970 = vmatmul.mubr.msk.bf16.gmra.mrb[8].mxu0 %vm556_vm2, %v2666_v49  ;;  %v3758_v49 = vld [vmem:[%s6923_s2] sm:$0xff] }
  0xac   : > { %4973 = vmatprep.mubr.msk.bf16.mxu0 %vm556_vm2, %v2668_v36  ;;  %3796 = vperm.xlu0 %5443, %v3758_v49   ;;  %v2679_v36 = vrot.slane %v6254_v24, 2 }
  0xae   : > { %v2680_v23 = vsel %vm2214_vm4, %v2677_v30, %v2679_v36 }
  0xb0   : > { %4804 = vmatmul.mubr.msk.bf16.gmra.mrb[32].mxu1 %vm556_vm2, %v6005_v4  ;;  %3801 = vperm.xlu0 %5443, %v3759_v42   ;;  %v2972_v42 = vshll.u32 %v6132_v37, 16 }
  0xb1   : > { %4809 = vmatprep.mubr.msk.bf16.mxu1 %vm556_vm2, %v1017_v18  ;;  %v1026_v18 = vrot.slane %v5859_v0, 1  ;;  %v3761_v0 = vld [vmem:[%s6923_s2 + $0x18] sm:$0xff] }
  0xb2   : > { %3811 = vperm.xlu1 %5444, %v3761_v0  }
  0xb3   : > { %4974 = vmatmul.mubr.msk.bf16.gmra.mrb[12].mxu0 %vm556_vm2, %v2670_v45  ;;  %v1028_v45 = vrot.slane %v5887_v35, 1  ;;  %v2681_v35 = vrot.slane %v6276_v10, 2 }
  0xb4   : > { %4977 = vmatprep.mubr.msk.bf16.mxu0 %vm556_vm2, %v2672_v44  ;;  %v6281_v44 = vld [vmem:[%s5779_s29 + $0x88] sm:$0xff]   ;;  %3816 = vperm.xlu0 %5443, %v3762_v14   ;;  %v5503_v14 = vld [vmem:[%s5779_s29 + $0xa0] ss:$0 sps:$4 sm:$0x33]  }
  0xb5   : > { %v1031_v49 = vsel %vm1014_vm5, %v1028_v45, %v1030_v34 }
  0xb6   : > { %3821 = vperm.xlu1 %5444, %v3763_v33   ;;  %v2974_v33 = vrot.slane %v2972_v42, 3  ;;  %v3772_v42 = vld [vmem:[%s6923_s2 + $0x70] sm:$0xff] }
  0xb8   : > { %4810 = vmatmul.mubr.msk.bf16.vlgmr.msra.gmra.mrb[0].mxu1 %vm556_vm2, %v1019_v62  ;;  %v1027_v62 = vsel %vm1014_vm5, %v1024_v17, %v1026_v18  ;;  %v6306_v17 = vld [vmem:[%s5779_s29 + $0x90] sm:$0xff]   ;;  %3826 = vperm.xlu0 %5443, %v3764_v61  }
  0xb9   : > { %4813 = vmatprep.mubr.msk.bf16.mxu1 %vm556_vm2, %v1021_v19  ;;  %4846 = vmatpush3.bf16.msra.mxu1 %v1546_v39  ;;  %v1029_v19 = vsel %vm1014_vm5, %v1026_v18, %v1028_v45  ;;  %v2683_v39 = vrot.slane %v6281_v44, 2  ;;  %v2977_v18 = vshrl.u32 %v6135_v38, 16  ;;  %v3767_v45 = vld [vmem:[%s6923_s2 + $0x48] sm:$0xff] }
  0xba   : > { %5368 = vmatprep.subr.msk.bf16.mxu1 %vm611_vm0, %v5507_v9  ;;  %v1032_v9 = vrot.slane %v5914_v63, 1  ;;  %v2685_v63 = vrot.slane %v6306_v17, 2  ;;  %3831 = vperm.xlu1 %5444, %v3765_v51   ;;  %v2989_v51 = vshll.u32 %v6148_v46, 16 }
  0xbb   : > { %4978 = vmatmul.mubr.msk.bf16.gmra.mrb[16].mxu0 %vm556_vm2, %v2674_v5  ;;  %v2682_v5 = vsel %vm2214_vm4, %v2679_v36, %v2681_v35  ;;  %v2969_v36 = vshrl.u32 %v6132_v37, 16  ;;  %v2979_v61 = vrot.slane %v2977_v18, 2  ;;  %v1038_v18 = vrot.slane %v5955_v58, 1  ;;  %v3773_v58 = vld [vmem:[%s6923_s2 + $0x78] sm:$0xff] }
  0xbc   : > { %4981 = vmatprep.mubr.msk.bf16.mxu0 %vm556_vm2, %v2676_v21  ;;  %v6310_v21 = vld [vmem:[%s5779_s29 + $0x98] sm:$0xff]   ;;  %v1033_v30 = vsel %vm1014_vm5, %v1030_v34, %v1032_v9  ;;  %3836 = vperm.xlu0 %5443, %v3766_v54   ;;  %v2686_v37 = vsel %vm2214_vm4, %v2683_v39, %v2685_v63 }
  0xbe   : > { %3841 = vperm.xlu1 %5444, %v3767_v45  }
  0xc0   : > { %4814 = vmatmul.mubr.msk.bf16.gmra.mrb[4].mxu1 %vm556_vm2, %v1023_v48  ;;  %v2684_v48 = vsel %vm2214_vm4, %v2681_v35, %v2683_v39  ;;  %v1036_v35 = vrot.slane %v5941_v41, 1  ;;  %v3770_v39 = vld [vmem:[%s6923_s2 + $0x60] sm:$0xff]  ;;  %v2689_v41 = vrot.slane %v5503_v14, 2 }
  0xc1   : > { %4817 = vmatprep.mubr.msk.bf16.mxu1 %vm556_vm2, %v1025_v6  ;;  %v2687_v6 = vrot.slane %v6310_v21, 2 }
  0xc3   : > { %4982 = vmatmul.mubr.msk.bf16.gmra.mrb[20].mxu0 %vm556_vm2, %v2678_v43  ;;  %v2980_v43 = vshll.u32 %v6135_v38, 16  ;;  %v2688_v0 = vsel %vm2214_vm4, %v2685_v63, %v2687_v6  ;;  %v2995_v63 = vshrl.u32 %v6152_v50, 16 }
  0xc4   : > { %4985 = vmatprep.mubr.msk.bf16.mxu0 %vm556_vm2, %v2680_v23  ;;  %v3768_v23 = vld [vmem:[%s6923_s2 + $0x50] sm:$0xff] }
  0xc5   : > { %v2982_v34 = vrot.slane %v2980_v43, 3  ;;  %3846 = vperm.xlu0 %5443, %v3768_v23   ;;  %v2690_v43 = vsel %vm2214_vm4, %v2687_v6, %v2689_v41  ;;  %v2991_v23 = vrot.slane %v2989_v51, 3  ;;  %v3774_v6 = vld [vmem:[%s6923_s2 + $0x80] sm:$0xff]  ;;  %v3776_v41 = vld [vmem:[%s6923_s2 + $0x90] sm:$0xff] }
  0xc8   : > { %4818 = vmatmul.mubr.msk.bf16.gmra.mrb[8].mxu1 %vm556_vm2, %v1027_v62  ;;  %v1034_v62 = vrot.slane %v5931_v25, 1  ;;  %v3769_v25 = vld [vmem:[%s6923_s2 + $0x58] sm:$0xff] }
  0xc9   : > { %4821 = vmatprep.mubr.msk.bf16.mxu1 %vm556_vm2, %v1029_v19  ;;  %v2971_v19 = vrot.slane %v2969_v36, 2  ;;  %3851 = vperm.xlu1 %5444, %v3769_v25   ;;  %v3771_v36 = vld [vmem:[%s6923_s2 + $0x68] sm:$0xff]  ;;  %v3016_v25 = vshll.u32 %v6170_v28, 16 }
  0xca   : > { %3856 = vperm.xlu0 %5443, %v3770_v39   ;;  %v3775_v39 = vld [vmem:[%s6923_s2 + $0x88] sm:$0xff] }
  0xcb   : > { %4986 = vmatmul.mubr.msk.bf16.gmra.mrb[24].mxu0 %vm556_vm2, %v2682_v5  ;;  %v1035_v5 = vsel %vm1014_vm5, %v1032_v9, %v1034_v62  ;;  %v2975_v54 = vor.u32 %v2974_v33, %v2971_v19  ;;  %v2983_v9 = vor.u32 %v2982_v34, %v2979_v61  ;;  %v1039_v19 = vsel %vm1014_vm5, %v1036_v35, %v1038_v18 }
  0xcc   : > { %4989 = vmatprep.mubr.msk.bf16.mxu0 %vm556_vm2, %v2684_v48  ;;  %v1037_v48 = vsel %vm1014_vm5, %v1034_v62, %v1036_v35  ;;  %v1040_v62 = vrot.slane %v5960_v11, 1  ;;  %v3004_v61 = vshrl.u32 %v6164_v53, 16  ;;  %v3007_v34 = vshll.u32 %v6164_v53, 16 }
  0xcd   : > { %3861 = vperm.xlu1 %5444, %v3771_v36   ;;  %v3013_v35 = vshrl.u32 %v6170_v28, 16 }
  0xce   : > { %3866 = vperm.xlu0 %5443, %v3772_v42   ;;  %v1041_v33 = vsel %vm1014_vm5, %v1038_v18, %v1040_v62  ;;  %v3006_v51 = vrot.slane %v3004_v61, 2  ;;  %v3018_v18 = vrot.slane %v3016_v25, 3  ;;  %v1048_v61 = vrot.slane %v6005_v4, 1 }
  0xcf   : > { %v3015_v42 = vrot.slane %v3013_v35, 2 }
  0xd0   : > { %4822 = vmatmul.mubr.msk.bf16.gmra.mrb[12].mxu1 %vm556_vm2, %v1031_v49  ;;  %v2986_v49 = vshrl.u32 %v6148_v46, 16 }
  0xd1   : > { %4825 = vmatprep.mubr.msk.bf16.mxu1 %vm556_vm2, %v1033_v30  ;;  %v2998_v30 = vshll.u32 %v6152_v50, 16  ;;  %3871 = vperm.xlu1 %5444, %v3773_v58   ;;  %v1046_v58 = vrot.slane %v5998_v56, 1  ;;  %v3781_v56 = vld [vmem:[%s6923_s2 + $0xb8] sm:$0xff] }
  0xd2   : > { %v2988_v45 = vrot.slane %v2986_v49, 2  ;;  %3876 = vperm.xlu0 %5443, %v3774_v6  }
  0xd3   : > { %4990 = vmatmul.mubr.msk.bf16.gmra.mrb[28].mxu0 %vm556_vm2, %v2686_v37  ;;  %v2984_v37 = vsel %vm2967_vm6, %v2975_v54, %v2983_v9  ;;  %v3000_v14 = vrot.slane %v2998_v30, 3  ;;  %v3009_v54 = vrot.slane %v3007_v34, 3  ;;  %v3507_v30 = vsel %vm611_vm0, %v6175_v29, 0  ;;  %v3778_v29 = vld [vmem:[%s6923_s2 + $0xa0] sm:$0xff] }
  0xd4   : > { %4993 = vmatprep.mubr.msk.bf16.mxu0 %vm556_vm2, %v2688_v0  ;;  %v2997_v0 = vrot.slane %v2995_v63, 2  ;;  %v2992_v11 = vor.u32 %v2991_v23, %v2988_v45  ;;  %v1044_v63 = vrot.slane %v5983_v40, 1  ;;  %v3777_v40 = vld [vmem:[%s6923_s2 + $0x98] sm:$0xff]  ;;  %v1049_v4 = vsel %vm1014_vm5, %v1046_v58, %v1048_v61 }
  0xd5   : > { %3881 = vperm.xlu1 %5444, %v3775_v39   ;;  %v3010_v45 = vor.u32 %v3009_v54, %v3006_v51  ;;  %v3049_v54 = vshrl.u32 %v6212_v8, 16 }
  0xd6   : > { %v2993_v49 = vsel %vm2967_vm6, %v2983_v9, %v2992_v11  ;;  %3886 = vperm.xlu0 %5443, %v3776_v41   ;;  %v3025_v9 = vshll.u32 %v6189_v3, 16  ;;  %v1047_v39 = vsel %vm1014_vm5, %v1044_v63, %v1046_v58  ;;  %v3061_v58 = vshll.u32 %v6225_v47, 16 }
  0xd8   : > { %4826 = vmatmul.mubr.msk.bf16.gmra.mrb[16].mxu1 %vm556_vm2, %v1035_v5  ;;  %v3001_v5 = vor.u32 %v3000_v14, %v2997_v0  ;;  %v3034_v0 = vshll.u32 %v6193_v1, 16  ;;  %v3779_v14 = vld [vmem:[%s6923_s2 + $0xa8] sm:$0xff] }
  0xd9   : > { %4829 = vmatprep.mubr.msk.bf16.mxu1 %vm556_vm2, %v1037_v48  ;;  %v1042_v48 = vrot.slane %v5977_v32, 1  ;;  %v3022_v32 = vshrl.u32 %v6189_v3, 16  ;;  %3891 = vperm.xlu1 %5444, %v3777_v40   ;;  %v5508_v40 = vld [vmem:[%s5779_s29 + $0x10] sm:$0xff]  }
  0xda   : > { %v3002_v36 = vsel %vm2967_vm6, %v2992_v11, %v3001_v5  ;;  %3896 = vperm.xlu0 %5443, %v3778_v29   ;;  %v3027_v11 = vrot.slane %v3025_v9, 3  ;;  %v3036_v25 = vrot.slane %v3034_v0, 3  ;;  %v1454_v9 = vrot.slane %v5810_v20, 1 }
  0xdb   : > { %4994 = vmatmul.mubr.msk.bf16.gmra.mrb[32].mxu0 %vm556_vm2, %v2690_v43  ;;  %v1043_v43 = vsel %vm1014_vm5, %v1040_v62, %v1042_v48  ;;  %v1045_v23 = vsel %vm1014_vm5, %v1042_v48, %v1044_v63  ;;  %v3031_v62 = vshrl.u32 %v6193_v1, 16  ;;  %v3024_v6 = vrot.slane %v3022_v32, 2 }
  0xdc   : > { %4999 = vmatprep.mubr.msk.bf16.mxu0 %vm556_vm2, %v2984_v37  ;;  %v3019_v37 = vor.u32 %v3018_v18, %v3015_v42  ;;  %v3040_v48 = vshrl.u32 %v6207_v13, 16  ;;  %v3052_v63 = vshll.u32 %v6212_v8, 16  ;;  %v1050_v18 = vrot.slane %v6028_v27, 1  ;;  %v3786_v27 = vld [vmem:[%s6923_s2 + $0xe0] sm:$0xff] }
  0xdd   : > { %v3033_v35 = vrot.slane %v3031_v62, 2  ;;  %3901 = vperm.xlu1 %5444, %v3779_v14   ;;  %v3028_v41 = vor.u32 %v3027_v11, %v3024_v6  ;;  %v1455_v29 = vrot.slane %v5508_v40, 1  ;;  %v3067_v11 = vshrl.u32 %v6230_v52, 16 }
  0xde   : > { %v3020_v34 = vsel %vm2967_vm6, %v3010_v45, %v3019_v37  ;;  %v3054_v62 = vrot.slane %v3052_v63, 3  ;;  %v1051_v20 = vsel %vm1014_vm5, %v1048_v61, %v1050_v18  ;;  %v3787_v61 = vld [vmem:[%s6923_s2 + $0xe8] sm:$0xff]  ;;  %v3789_v63 = vld [vmem:[%s6923_s2 + $0xf8] sm:$0xff]  ;;  %v3076_v18 = vshrl.u32 %v6245_v16, 16 }
  0xdf   : > { %v3037_v51 = vor.u32 %v3036_v25, %v3033_v35  ;;  %v3029_v42 = vsel %vm2967_vm6, %v3019_v37, %v3028_v41  ;;  %v3785_v37 = vld [vmem:[%s6923_s2 + $0xd8] sm:$0xff]  ;;  %v1456_v14 = vsel %vm1014_vm5, %v1454_v9, %v1455_v29  ;;  %v3085_v9 = vshrl.u32 %v6254_v24, 16 }
  0xe0   : > { %4830 = vmatmul.mubr.msk.bf16.gmra.mrb[20].mxu1 %vm556_vm2, %v1039_v19  ;;  %v3780_v19 = vld [vmem:[%s6923_s2 + $0xb0] sm:$0xff]  ;;  %v5509_v35 = vld [vmem:[%s5779_s29 + $0x18] sm:$0xff]   ;;  %v3088_v40 = vshll.u32 %v6254_v24, 16 }
  0xe1   : > { %4833 = vmatprep.mubr.msk.bf16.mxu1 %vm556_vm2, %v1041_v33  ;;  %v3011_v33 = vsel %vm2967_vm6, %v3001_v5, %v3010_v45  ;;  %3906 = vperm.xlu0 %5443, %v3780_v19   ;;  %v3782_v5 = vld [vmem:[%s6923_s2 + $0xc0] sm:$0xff]  ;;  %v3038_v45 = vsel %vm2967_vm6, %v3028_v41, %v3037_v51  ;;  %v3058_v19 = vshrl.u32 %v6225_v47, 16  ;;  %v1457_v25 = vrot.slane %v5509_v35, 1 }
  0xe2   : > { %3911 = vperm.xlu1 %5444, %v3781_v56   ;;  %v3063_v56 = vrot.slane %v3061_v58, 3  ;;  %v3087_v58 = vrot.slane %v3085_v9, 2  ;;  %v3097_v35 = vshll.u32 %v6276_v10, 16  ;;  %v3115_v9 = vshll.u32 %v6306_v17, 16 }
  0xe3   : > { %5000 = vmatmul.mubr.msk.bf16.vlgmr.msra.gmra.mrb[0].mxu0 %vm556_vm2, %v2993_v49  ;;  %v3043_v49 = vshll.u32 %v6207_v13, 16  ;;  %v3060_v41 = vrot.slane %v3058_v19, 2 }
  0xe4   : > { %5036 = vmatpush3.bf16.msra.mxu0 %v3507_v30  ;;  %5003 = vmatprep.mubr.msk.bf16.mxu0 %vm556_vm2, %v3002_v36  ;;  %v3783_v30 = vld [vmem:[%s6923_s2 + $0xc8] sm:$0xff]  ;;  %v3784_v36 = vld [vmem:[%s6923_s2 + $0xd0] sm:$0xff] }
  0xe5   : > { %3916 = vperm.xlu0 %5443, %v3782_v5   ;;  %v3045_v32 = vrot.slane %v3043_v49, 3  ;;  %v5510_v5 = vld [vmem:[%s5779_s29 + $0x20] sm:$0xff]   ;;  %v3069_v49 = vrot.slane %v3067_v11, 2  ;;  %v3090_v11 = vrot.slane %v3088_v40, 3 }
  0xe6   : > { %3921 = vperm.xlu1 %5444, %v3783_v30   ;;  %v3790_v30 = vld [vmem:[%s6923_s2 + $0x100] sm:$0xff] }
  0xe8   : > { %4834 = vmatmul.mubr.msk.bf16.gmra.mrb[24].mxu1 %vm556_vm2, %v1043_v43  ;;  %v3042_v43 = vrot.slane %v3040_v48, 2 }
  0xe9   : > { %4837 = vmatprep.mubr.msk.bf16.mxu1 %vm556_vm2, %v1045_v23  ;;  %v3051_v23 = vrot.slane %v3049_v54, 2  ;;  %3926 = vperm.xlu0 %5443, %v3784_v36   ;;  %v3064_v36 = vor.u32 %v3063_v56, %v3060_v41  ;;  %v3106_v41 = vshll.u32 %v6281_v44, 16  ;;  %v5513_v56 = vld [vmem:[%s5779_s29 + $0x38] sm:$0xff]  }
  0xea   : > { %v3046_v0 = vor.u32 %v3045_v32, %v3042_v43  ;;  %3931 = vperm.xlu1 %5444, %v3785_v37   ;;  %v3079_v43 = vshll.u32 %v6245_v16, 16 }
  0xeb   : > { %5004 = vmatmul.mubr.msk.bf16.gmra.mrb[4].mxu0 %vm556_vm2, %v3011_v33  ;;  %v3055_v6 = vor.u32 %v3054_v62, %v3051_v23  ;;  %v3070_v33 = vshll.u32 %v6230_v52, 16  ;;  %v5511_v23 = vld [vmem:[%s5779_s29 + $0x28] sm:$0xff]  }
  0xec   : > { %5007 = vmatprep.mubr.msk.bf16.mxu0 %vm556_vm2, %v3020_v34  ;;  %v3788_v34 = vld [vmem:[%s6923_s2 + $0xf0] sm:$0xff]  ;;  %v1461_v62 = vrot.slane %v5511_v23, 1  ;;  %v5515_v23 = vld [vmem:[%s5779_s29 + $0x48] sm:$0xff]  }
  0xed   : > { %3936 = vperm.xlu0 %5443, %v3786_v27   ;;  %v3056_v48 = vsel %vm2967_vm6, %v3046_v0, %v3055_v6  ;;  %v3072_v54 = vrot.slane %v3070_v33, 3  ;;  %v3065_v37 = vsel %vm2967_vm6, %v3055_v6, %v3064_v36  ;;  %v3078_v27 = vrot.slane %v3076_v18, 2  ;;  %v3793_v33 = vld [vmem:[%s6923_s2 + $0x118] sm:$0xff] }
  0xee   : > { %3941 = vperm.xlu1 %5444, %v3787_v61  }
  0xef   : > { %v3073_v32 = vor.u32 %v3072_v54, %v3069_v49  ;;  %v3099_v49 = vrot.slane %v3097_v35, 3  ;;  %v5514_v54 = vld [vmem:[%s5779_s29 + $0x40] sm:$0xff]  }
  0xf0   : > { %4838 = vmatmul.mubr.msk.bf16.gmra.mrb[28].mxu1 %vm556_vm2, %v1047_v39  ;;  %v3047_v39 = vsel %vm2967_vm6, %v3037_v51, %v3046_v0  ;;  %v1458_v51 = vsel %vm1014_vm5, %v1455_v29, %v1457_v25  ;;  %v3791_v29 = vld [vmem:[%s6923_s2 + $0x108] sm:$0xff]  ;;  %v5512_v0 = vld [vmem:[%s5779_s29 + $0x30] sm:$0xff]  }
  0xf1   : > { %4841 = vmatprep.mubr.msk.bf16.mxu1 %vm556_vm2, %v1049_v4  ;;  %v1459_v4 = vrot.slane %v5510_v5, 1  ;;  %3946 = vperm.xlu0 %5443, %v3788_v34   ;;  %v3074_v19 = vsel %vm2967_vm6, %v3064_v36, %v3073_v32  ;;  %v3094_v34 = vshrl.u32 %v6276_v10, 16  ;;  %v1465_v5 = vrot.slane %v5513_v56, 1 }
  0xf2   : > { %3951 = vperm.xlu1 %5444, %v3789_v63   ;;  %v1467_v63 = vrot.slane %v5514_v54, 1  ;;  %v3108_v36 = vrot.slane %v3106_v41, 3  ;;  %v5517_v41 = vld [vmem:[%s5779_s29 + $0x58] sm:$0xff]  }
  0xf3   : > { %5008 = vmatmul.mubr.msk.bf16.gmra.mrb[8].mxu0 %vm556_vm2, %v3029_v42  ;;  %v1460_v42 = vsel %vm1014_vm5, %v1457_v25, %v1459_v4  ;;  %v3091_v25 = vor.u32 %v3090_v11, %v3087_v58  ;;  %v1473_v56 = vrot.slane %v5517_v41, 1  ;;  %v1876_v41 = vshrl.u32 %v6074_v57, 16 }
  0xf4   : > { %5011 = vmatprep.mubr.msk.bf16.mxu0 %vm556_vm2, %v3038_v45  ;;  %v3792_v45 = vld [vmem:[%s6923_s2 + $0x110] sm:$0xff] }
  0xf5   : > { %3956 = vperm.xlu0 %5443, %v3790_v30  }
  0xf6   : > { %3961 = vperm.xlu1 %5444, %v3791_v29   ;;  %v3121_v29 = vshrl.u32 %v6310_v21, 16 }
  0xf8   : > { %4842 = vmatmul.mubr.msk.bf16.gmra.mrb[32].mxu1 %vm556_vm2, %v1051_v20  ;;  %v3081_v20 = vrot.slane %v3079_v43, 3  ;;  %v1468_v43 = vsel %vm1014_vm5, %v1465_v5, %v1467_v63  ;;  %v3123_v11 = vrot.slane %v3121_v29, 2 }
  0xf9   : > { %4847 = vmatprep.mubr.msk.bf16.mxu1 %vm556_vm2, %v1456_v14  ;;  %v1463_v14 = vrot.slane %v5512_v0, 1  ;;  %3966 = vperm.xlu0 %5443, %v3792_v45   ;;  %v3124_v45 = vshll.u32 %v6310_v21, 16  ;;  %v5516_v0 = vld [vmem:[%s5779_s29 + $0x50] sm:$0xff]  }
  0xfa   : > { %v3082_v6 = vor.u32 %v3081_v20, %v3078_v27  ;;  %3971 = vperm.xlu1 %5444, %v3793_v33   ;;  %v3117_v20 = vrot.slane %v3115_v9, 3 }
  0xfb   : > { %5012 = vmatmul.mubr.msk.bf16.gmra.mrb[12].mxu0 %vm556_vm2, %v3047_v39  ;;  %v1464_v61 = vsel %vm1014_vm5, %v1461_v62, %v1463_v14  ;;  %v3103_v39 = vshrl.u32 %v6281_v44, 16  ;;  %v3126_v33 = vrot.slane %v3124_v45, 3  ;;  %v3420_v45 = vrot.slane %v6152_v50, 3 }
  0xfc   : > { %5015 = vmatprep.mubr.msk.bf16.mxu0 %vm556_vm2, %v3056_v48  ;;  %v3096_v48 = vrot.slane %v3094_v34, 2  ;;  %v3092_v30 = vsel %vm2967_vm6, %v3082_v6, %v3091_v25  ;;  %v3422_v50 = vrot.slane %v6164_v53, 3 }
  0xfe   : > { %v3100_v18 = vor.u32 %v3099_v49, %v3096_v48  ;;  %v1475_v49 = vrot.slane %v6055_v55, 1 }
 0x100   : > { %4848 = vmatmul.mubr.msk.bf16.vlgmr.msra.gmra.mrb[0].mxu1 %vm556_vm2, %v1458_v51  ;;  %v3105_v51 = vrot.slane %v3103_v39, 2  ;;  %v3408_v39 = vld [vmem:[%s5779_s29 + $0x10] sm:$0x8] }
 0x101   : > { %4851 = vmatprep.mubr.msk.bf16.mxu1 %vm556_vm2, %v1460_v42  ;;  %5074 = vmatpush3.bf16.msra.mxu1 %v5763_v2  ;;  %v1462_v2 = vsel %vm1014_vm5, %v1459_v4, %v1461_v62  ;;  %v3083_v4 = vsel %vm2967_vm6, %v3073_v32, %v3082_v6  ;;  %v1466_v42 = vsel %vm1014_vm5, %v1463_v14, %v1465_v5  ;;  %v3112_v32 = vshrl.u32 %v6306_v17, 16 }
 0x102   : > { %v3109_v40 = vor.u32 %v3108_v36, %v3105_v51  ;;  %v1469_v62 = vrot.slane %v5515_v23, 1  ;;  %v1471_v14 = vrot.slane %v5516_v0, 1  ;;  %v1476_v36 = vsel %vm1014_vm5, %v1473_v56, %v1475_v49 }
 0x103   : > { %5016 = vmatmul.mubr.msk.bf16.gmra.mrb[16].mxu0 %vm556_vm2, %v3065_v37  ;;  %v3101_v37 = vsel %vm2967_vm6, %v3091_v25, %v3100_v18  ;;  %v3114_v27 = vrot.slane %v3112_v32, 2  ;;  %v3127_v25 = vor.u32 %v3126_v33, %v3123_v11  ;;  %v1479_v32 = vrot.slane %v6080_v60, 1 }
 0x104   : > { %5019 = vmatprep.mubr.msk.bf16.mxu0 %vm556_vm2, %v3074_v19  ;;  %v6533_v19 = vld [vmem:[%s5779_s29 + $0xa0] ss:$0 sps:$4 sm:$0x77]   ;;  %v3110_v58 = vsel %vm2967_vm6, %v3100_v18, %v3109_v40  ;;  %v3416_v18 = vrot.slane %v6135_v38, 3  ;;  %v3418_v38 = vrot.slane %v6148_v46, 3  ;;  %v1481_v23 = vrot.slane %v6092_v7, 1 }
 0x105   : > { %v3118_v6 = vor.u32 %v3117_v20, %v3114_v27  ;;  %v3130_v34 = vshrl.u32 %v6533_v19, 16  ;;  %v3133_v35 = vshll.u32 %v6533_v19, 16  ;;  %v3424_v0 = vrot.slane %v6170_v28, 3 }
 0x106   : > { %v3421_v27 = vsel %vm3414_vm7, %v3418_v38, %v3420_v45  ;;  %v1482_v46 = vsel %vm1014_vm5, %v1479_v32, %v1481_v23  ;;  %v1487_v11 = vrot.slane %v6112_v26, 1  ;;  %v1867_v33 = vshrl.u32 %v6055_v55, 16 }
 0x107   : > { %v3119_v5 = vsel %vm2967_vm6, %v3109_v40, %v3118_v6  ;;  %v3135_v48 = vrot.slane %v3133_v35, 3  ;;  %v3128_v54 = vsel %vm2967_vm6, %v3118_v6, %v3127_v25  ;;  %v3425_v53 = vsel %vm3414_vm7, %v3422_v50, %v3424_v0  ;;  %v5506_v6 = vld [vmem:[%s5779_s29 + $0x98] ss:$0 sps:$4 sm:$0x11]   ;;  %s6699_s29 = sand.u32 1, %s5640_s19  }
 0x108   : > { %4852 = vmatmul.mubr.msk.bf16.gmra.mrb[4].mxu1 %vm556_vm2, %v1462_v2  ;;  %v1470_v2 = vsel %vm1014_vm5, %v1467_v63, %v1469_v62  ;;  %v4535_v63 = vcombine.low %v3408_v39, %v6122_v31  ;;  %v1869_v35 = vrot.slane %v1867_v33, 1  ;;  %v3428_v39 = vrot.slane %v6193_v1, 3  ;;  %s5373_s7 = smul.u32 288, %s6699_s29  ;;  %s4131_s14 = scalar_lea.sflag [#allocation3], %s6699_s29 }
 0x109   : > { %4855 = vmatprep.mubr.msk.bf16.mxu1 %vm556_vm2, %v1464_v61  ;;  %v1472_v61 = vsel %vm1014_vm5, %v1469_v62, %v1471_v14  ;;  %v3419_v62 = vsel %vm3414_vm7, %v3416_v18, %v3418_v38 }
 0x10a   : > { %s6708_s8 = scalar_lea.vmem [#allocation2], %s5373_s7 }
 0x10b   : > { %5020 = vmatmul.mubr.msk.bf16.gmra.mrb[20].mxu0 %vm556_vm2, %v3083_v4  ;;  %v3132_v4 = vrot.slane %v3130_v34, 2  ;;  %s4153_s10 = sshll.u32 %s6708_s8, 4  ;;  %s6791_s10 = int_to_ptr.vmem [resolvable:$true] %s4153_s10 }
 0x10c   : > { %5023 = vmatprep.mubr.msk.bf16.mxu0 %vm556_vm2, %v3092_v30  ;;  %v1474_v30 = vsel %vm1014_vm5, %v1471_v14, %v1473_v56  ;;  %v1485_v14 = vrot.slane %v6108_v22, 1  ;;  %v1879_v56 = vshll.u32 %v6074_v57, 16  ;;  %s5518_s15 = scalar_lea.vmem %s6791_s10, 4608  ;;  %p5525_p1 = scmp.lt.s32.totalorder %s6791_s10, %s5523_s17 }
 0x10d   : > { %v3136_v51 = vor.u32 %v3135_v48, %v3132_v4  ;;  %v1888_v48 = vshll.u32 %v6080_v60, 16  ;;  %p5519_p12 = scmp.ne.s32.totalorder %s6791_s10, %s5518_s15  ;;  %p5526_p2 = scmp.lt.s32.totalorder %s5524_s27, %s5518_s15 }
 0x10e   : > { %v1488_v34 = vsel %vm1014_vm5, %v1485_v14, %v1487_v11 }
 0x10f   : > { %v3137_v31 = vsel %vm2967_vm6, %v3127_v25, %v3136_v51  ;;  %p5520_p13 = pnand %p5519_p12, %p5736_p4  ;;  %p5527_p3 = por %p5526_p2, %p5525_p1 }
 0x110   : > { %4856 = vmatmul.mubr.msk.bf16.gmra.mrb[8].mxu1 %vm556_vm2, %v1466_v42  ;;  %v3415_v42 = vrot.slane %v4535_v63, 3  ;;  %v1881_v63 = vrot.slane %v1879_v56, 2 }
 0x111   : > { %4859 = vmatprep.mubr.msk.bf16.mxu1 %vm556_vm2, %v1468_v43  ;;  %v1477_v43 = vrot.slane %v6074_v57, 1  ;;  %p5521_p0 = pneg %p5520_p13 }
 0x112   : > { %v3417_v9 = vsel %vm3414_vm7, %v3415_v42, %v3416_v18  ;;  %v3432_v42 = vrot.slane %v6212_v8, 3  ;;  %v1894_v18 = vshrl.u32 %v6092_v7, 16 }
 0x113   : > { %5024 = vmatmul.mubr.msk.bf16.gmra.mrb[24].mxu0 %vm556_vm2, %v3101_v37  ;;  %v1478_v40 = vsel %vm1014_vm5, %v1475_v49, %v1477_v43  ;;  %v1480_v29 = vsel %vm1014_vm5, %v1477_v43, %v1479_v32  ;;  %v1483_v37 = vrot.slane %v6096_v12, 1  ;;  %v1897_v43 = vshll.u32 %v6092_v7, 16  ;;  %p5528_p5 = pnand %p5527_p3, %p5521_p0 }
 0x114   : > { %5027 = vmatprep.mubr.msk.bf16.mxu0 %vm556_vm2, %v3110_v58  ;;  %v3423_v58 = vsel %vm3414_vm7, %v3420_v45, %v3422_v50 }
 0x115   : > { %v1484_v20 = vsel %vm1014_vm5, %v1481_v23, %v1483_v37  ;;  %v1486_v28 = vsel %vm1014_vm5, %v1483_v37, %v1485_v14  ;;  %v1899_v38 = vrot.slane %v1897_v43, 2  ;;  %v1912_v37 = vshrl.u32 %v6108_v22, 16 }
 0x117   : > { %v1914_v14 = vrot.slane %v1912_v37, 1 }
 0x118   : > { %4860 = vmatmul.mubr.msk.bf16.gmra.mrb[12].mxu1 %vm556_vm2, %v1470_v2  ;;  %v1870_v2 = vshll.u32 %v6055_v55, 16  ;;  %v1489_v55 = vrot.slane %v5506_v6, 1  ;;  %v1933_v6 = vshll.u32 %v6128_v59, 16 }
 0x119   : > { %4863 = vmatprep.mubr.msk.bf16.mxu1 %vm556_vm2, %v1472_v61  ;;  %v3426_v61 = vrot.slane %v6189_v3, 3  ;;  %v1885_v3 = vshrl.u32 %v6080_v60, 16 }
 0x11a   : > { %v1872_v25 = vrot.slane %v1870_v2, 2  ;;  %v1490_v1 = vsel %vm1014_vm5, %v1487_v11, %v1489_v55  ;;  %v3438_v11 = vrot.slane %v6245_v16, 3 }
 0x11b   : > { %5028 = vmatmul.mubr.msk.bf16.gmra.mrb[28].mxu0 %vm556_vm2, %v3119_v5  ;;  %v3427_v5 = vsel %vm3414_vm7, %v3424_v0, %v3426_v61  ;;  %v3429_v49 = vsel %vm3414_vm7, %v3426_v61, %v3428_v39  ;;  %v1887_v51 = vrot.slane %v1885_v3, 1  ;;  %v3448_v3 = vrot.slane %v6310_v21, 3 }
 0x11c   : > { %5031 = vmatprep.mubr.msk.bf16.mxu0 %vm556_vm2, %v3128_v54  ;;  %v1873_v4 = vor.u32 %v1872_v25, %v1869_v35  ;;  %v1878_v54 = vrot.slane %v1876_v41, 1  ;;  %v3444_v41 = vrot.slane %v6281_v44, 3 }
 0x11e   : > { %v1874_v57 = vsel %vm1767_vm3, %v5969_v15, %v1873_v4  ;;  %v1882_v60 = vor.u32 %v1881_v63, %v1878_v54  ;;  %v1906_v15 = vshll.u32 %v6096_v12, 16 }
 0x120   : > { %4864 = vmatmul.mubr.msk.bf16.gmra.mrb[16].mxu1 %vm556_vm2, %v1474_v30  ;;  %v3430_v30 = vrot.slane %v6207_v13, 3  ;;  %v1903_v13 = vshrl.u32 %v6096_v12, 16  ;;  %v1883_v8 = vsel %vm1767_vm3, %v1873_v4, %v1882_v60  ;;  %v1908_v23 = vrot.slane %v1906_v15, 2 }
 0x121   : > { %4867 = vmatprep.mubr.msk.bf16.mxu1 %vm556_vm2, %v1476_v36  ;;  %v1890_v36 = vrot.slane %v1888_v48, 2 }
 0x122   : > { %v1905_v45 = vrot.slane %v1903_v13, 1 }
 0x123   : > { %5032 = vmatmul.mubr.msk.bf16.gmra.mrb[32].mxu0 %vm556_vm2, %v3137_v31  ;;  %v3431_v31 = vsel %vm3414_vm7, %v3428_v39, %v3430_v30  ;;  %v1891_v32 = vor.u32 %v1890_v36, %v1887_v51  ;;  %v3442_v39 = vrot.slane %v6276_v10, 3  ;;  %v3446_v10 = vrot.slane %v6306_v17, 3 }
 0x124   : > { %5037 = vmatprep.mubr.msk.bf16.mxu0 %vm556_vm2, %v3417_v9  ;;  %v3433_v9 = vsel %vm3414_vm7, %v3430_v30, %v3432_v42  ;;  %v1909_v50 = vor.u32 %v1908_v23, %v1905_v45 }
 0x125   : > { %v1892_v7 = vsel %vm1767_vm3, %v1882_v60, %v1891_v32  ;;  %v3447_v44 = vsel %vm3414_vm7, %v3444_v41, %v3446_v10  ;;  %v3449_v48 = vsel %vm3414_vm7, %v3446_v10, %v3448_v3  ;;  %v3807_v60 = vpop.permute.xlu1 %3806 }
 0x128   : > { %4868 = vmatmul.mubr.msk.bf16.gmra.mrb[20].mxu1 %vm556_vm2, %v1478_v40  ;;  %v1896_v40 = vrot.slane %v1894_v18, 1 }
 0x129   : > { %4871 = vmatprep.mubr.msk.bf16.mxu1 %vm556_vm2, %v1480_v29  ;;  %v3434_v29 = vrot.slane %v6225_v47, 3  ;;  %v1921_v47 = vshrl.u32 %v6112_v26, 16 }
 0x12a   : > { %v1900_v12 = vor.u32 %v1899_v38, %v1896_v40 }
 0x12b   : > { %5038 = vmatmul.mubr.msk.bf16.vlgmr.msra.gmra.mrb[0].mxu0 %vm556_vm2, %v3419_v62  ;;  %v3436_v62 = vrot.slane %v6230_v52, 3  ;;  %v1923_v33 = vrot.slane %v1921_v47, 1  ;;  %v3797_v36 = vpop.permute.xlu0 %3796 }
 0x12c   : > { %5041 = vmatprep.mubr.msk.bf16.mxu0 %vm556_vm2, %v3421_v27  ;;  %v1915_v27 = vshll.u32 %v6108_v22, 16  ;;  %v1901_v52 = vsel %vm1767_vm3, %v1891_v32, %v1900_v12  ;;  %v1910_v22 = vsel %vm1767_vm3, %v1900_v12, %v1909_v50 }
 0x12d   : > { %v3437_v0 = vsel %vm3414_vm7, %v3434_v29, %v3436_v62  ;;  %v3439_v61 = vsel %vm3414_vm7, %v3436_v62, %v3438_v11 }
 0x12f   : > { %v3802_v43 = vpop.permute.xlu0 %3801 }
 0x130   : > { %4872 = vmatmul.mubr.msk.bf16.gmra.mrb[24].mxu1 %vm556_vm2, %v1482_v46  ;;  %v3435_v46 = vsel %vm3414_vm7, %v3432_v42, %v3434_v29 }
 0x131   : > { %4875 = vmatprep.mubr.msk.bf16.mxu1 %vm556_vm2, %v1484_v20  ;;  %v1924_v20 = vshll.u32 %v6112_v26, 16  ;;  %v3812_v32 = vpop.permute.xlu1 %3811 }
 0x133   : > { %5042 = vmatmul.mubr.msk.bf16.gmra.mrb[4].mxu0 %vm556_vm2, %v3423_v58  ;;  %v1917_v58 = vrot.slane %v1915_v27, 2  ;;  %v1926_v2 = vrot.slane %v1924_v20, 2  ;;  %v3817_v15 = vpop.permute.xlu0 %3816 }
 0x134   : > { %5045 = vmatprep.mubr.msk.bf16.mxu0 %vm556_vm2, %v3425_v53  ;;  %v3440_v53 = vrot.slane %v6254_v24, 3  ;;  %v1935_v24 = vrot.slane %v1933_v6, 2 }
 0x135   : > { %v1918_v26 = vor.u32 %v1917_v58, %v1914_v14 }
 0x136   : > { %v3441_v16 = vsel %vm3414_vm7, %v3438_v11, %v3440_v53  ;;  %v3443_v56 = vsel %vm3414_vm7, %v3440_v53, %v3442_v39 }
 0x137   : > { %v1919_v35 = vsel %vm1767_vm3, %v1909_v50, %v1918_v26 }
 0x138   : > { %4876 = vmatmul.mubr.msk.bf16.gmra.mrb[28].mxu1 %vm556_vm2, %v1486_v28  ;;  %v1930_v28 = vshrl.u32 %v6128_v59, 16 }
 0x139   : > { %4879 = vmatprep.mubr.msk.bf16.mxu1 %vm556_vm2, %v1488_v34  ;;  %v1927_v34 = vor.u32 %v1926_v2, %v1923_v33 }
 0x13a   : > { %v1932_v25 = vrot.slane %v1930_v28, 1 }
 0x13b   : > { %5046 = vmatmul.mubr.msk.bf16.gmra.mrb[8].mxu0 %vm556_vm2, %v3427_v5  ;;  %v1928_v55 = vsel %vm1767_vm3, %v1918_v26, %v1927_v34  ;;  %v3445_v5 = vsel %vm3414_vm7, %v3442_v39, %v3444_v41 }
 0x13c   : > { %5049 = vmatprep.mubr.msk.bf16.mxu0 %vm556_vm2, %v3429_v49  ;;  %v1936_v59 = vor.u32 %v1935_v24, %v1932_v25  ;;  %v3450_v49 = vrot.slane %v6533_v19, 3 }
 0x13e   : > { %v1937_v4 = vsel %vm1767_vm3, %v1927_v34, %v1936_v59 }
 0x140   : > { %4880 = vmatmul.mubr.msk.bf16.gmra.mrb[32].mxu1 %vm556_vm2, %v1490_v1  ;;  %v3451_v1 = vsel %vm3414_vm7, %v3448_v3, %v3450_v49 }
 0x141   : > { %4905 = vmatprep.mubr.msk.bf16.mxu1 %vm556_vm2, %v1874_v57 }
 0x143   : > { %5050 = vmatmul.mubr.msk.bf16.gmra.mrb[12].mxu0 %vm556_vm2, %v3431_v31 }
 0x144   : > { %5053 = vmatprep.mubr.msk.bf16.mxu0 %vm556_vm2, %v3433_v9 }
 0x148   : > { %4906 = vmatmul.mubr.msk.bf16.vlgmr.msra.gmra.mrb[20].mxu1 %vm556_vm2, %v1883_v8  ;;  %v6678_v8 = vpop.permute.xlu1 %3821 }
 0x149   : > { %4909 = vmatprep.mubr.msk.bf16.mxu1 %vm556_vm2, %v1892_v7  ;;  %v3827_v7 = vpop.permute.xlu0 %3826 }
 0x14b   : > { %5054 = vmatmul.mubr.msk.bf16.gmra.mrb[16].mxu0 %vm556_vm2, %v3435_v46 }
 0x14c   : > { %5057 = vmatprep.mubr.msk.bf16.mxu0 %vm556_vm2, %v3437_v0  ;;  %v3832_v45 = vpop.permute.xlu1 %3831 }
 0x14d   : > { %v6692_v37 = vpop.permute.xlu0 %3836 }
 0x150   : > { %4910 = vmatmul.mubr.msk.bf16.gmra.mrb[24].mxu1 %vm556_vm2, %v1901_v52  ;;  %v6696_v46 = vpop.permute.xlu1 %3841 }
 0x151   : > { %4913 = vmatprep.mubr.msk.bf16.mxu1 %vm556_vm2, %v1910_v22  ;;  %v6701_v50 = vpop.permute.xlu0 %3846 }
 0x153   : > { %5058 = vmatmul.mubr.msk.bf16.gmra.mrb[20].mxu0 %vm556_vm2, %v3439_v61 }
 0x154   : > { %5061 = vmatprep.mubr.msk.bf16.mxu0 %vm556_vm2, %v3441_v16  ;;  %v6704_v47 = vpop.permute.xlu1 %3851 }
 0x155   : > { %v6706_v14 = vpop.permute.xlu0 %3856 }
 0x158   : > { %4914 = vmatmul.mubr.msk.bf16.gmra.mrb[28].mxu1 %vm556_vm2, %v1919_v35  ;;  %v6711_v2 = vpop.permute.xlu1 %3861 }
 0x159   : > { %4917 = vmatprep.mubr.msk.bf16.mxu1 %vm556_vm2, %v1928_v55  ;;  %v6716_v34 = vpop.permute.xlu0 %3866 }
 0x15b   : > { %5062 = vmatmul.mubr.msk.bf16.gmra.mrb[24].mxu0 %vm556_vm2, %v3443_v56 }
 0x15c   : > { %5065 = vmatprep.mubr.msk.bf16.mxu0 %vm556_vm2, %v3445_v5  ;;  %v6718_v41 = vpop.permute.xlu1 %3871 }
 0x160   : > { %4918 = vmatmul.mubr.msk.bf16.gmra.mrb[32].mxu1 %vm556_vm2, %v1937_v4 }
 0x163   : > { %5066 = vmatmul.mubr.msk.bf16.gmra.mrb[28].mxu0 %vm556_vm2, %v3447_v44 }
 0x164   : > { %5069 = vmatprep.mubr.msk.bf16.mxu0 %vm556_vm2, %v3449_v48 }
 0x16b   : > { %5070 = vmatmul.mubr.msk.bf16.gmra.mrb[32].mxu0 %vm556_vm2, %v3451_v1 }
 0x1d3   : > { %v4849_v54 = vpop.f32.mrb[0].mxu1 }
 0x1d4   : > { %v1582_v17 = vpop.f32.mrb[1].mxu1 }
 0x1d5   : > { %v4850_v63 = vpop.f32.mrb[2].mxu1 }
 0x1d6   : > { %v1585_v21 = vpop.f32.mrb[3].mxu1 }
 0x1db   : > { %v4853_v30 = vpop.f32.mrb[4].mxu1 }
 0x1dc   : > { %v1598_v57 = vpop.f32.mrb[5].mxu1 }
 0x1dd   : > { %v4854_v51 = vpop.f32.mrb[6].mxu1 }
 0x1de   : > { %v6666_v42 = vpop.f32.mrb[7].mxu1 }
 0x1e3   : > { %v6668_v18 = vpop.f32.mrb[8].mxu1 }
 0x1e4   : > { %v6670_v31 = vpop.f32.mrb[9].mxu1 }
 0x1e5   : > { %v6672_v19 = vpop.f32.mrb[10].mxu1 }
 0x1e6   : > { %v6674_v13 = vpop.f32.mrb[11].mxu1 }
 0x1eb   : > { %v6676_v9 = vpop.f32.mrb[12].mxu1 }
 0x1ec   : > { %v6680_v40 = vpop.f32.mrb[13].mxu1 }
 0x1ed   : > { %v6682_v38 = vpop.f32.mrb[14].mxu1 }
 0x1ee   : > { %v6684_v29 = vpop.f32.mrb[15].mxu1 }
 0x1f3   : > { %v6686_v23 = vpop.f32.mrb[16].mxu1 }
 0x1f4   : > { %v6688_v62 = vpop.f32.mrb[17].mxu1 }
 0x1f5   : > { %v6690_v12 = vpop.f32.mrb[18].mxu1 }
 0x1f6   : > { %v6694_v27 = vpop.f32.mrb[19].mxu1 }
 0x1fe   : > { %v5039_v20 = vpop.f32.mrb[0].mxu0 }
 0x1ff   : > { %v5075_v0 = vadd.f32 %v5039_v20, %v4849_v54  ;;  %v3543_v52 = vpop.f32.mrb[1].mxu0 }
 0x200   : > { %v5076_v58 = vadd.f32 %v3543_v52, %v1582_v17  ;;  %v5040_v11 = vpop.f32.mrb[2].mxu0 }
 0x201   : > { %3724 = vst [vmem:[%s6708_s8 + $0x10] sm:$0xff] %v5075_v0  ;;  %v5077_v22 = vadd.f32 %v5040_v11, %v4850_v63  ;;  %v3546_v33 = vpop.f32.mrb[3].mxu0  ;;  %v3976_v28 = vmul.f32 %v5075_v0, %v3807_v60 }
 0x202   : > { %3722 = vst [vmem:[%s6708_s8] sm:$0xff] %v5076_v58  ;;  %v3974_v53 = vmul.f32 %v5076_v58, %v3797_v36  ;;  %v5078_v26 = vadd.f32 %v3546_v33, %v1585_v21  ;;  %v6724_v21 = vpop.permute.xlu0 %3876 }
 0x203   : > { %3725 = vst [vmem:[%s6708_s8 + $0x18] sm:$0xff] %v5077_v22  ;;  %v3977_v61 = vmul.f32 %v5077_v22, %v3812_v32  ;;  %v4054_v59 = vmul.f32 %v3976_v28, %v3976_v28 }
 0x204   : > { %3723 = vst [vmem:[%s6708_s8 + $0x8] sm:$0xff] %v5078_v26  ;;  %v3975_v6 = vmul.f32 %v5078_v26, %v3802_v43  ;;  %v4052_v16 = vmul.f32 %v3974_v53, %v3974_v53 }
 0x205   : > { %v4055_v3 = vmul.f32 %v3977_v61, %v3977_v61 }
 0x206   : > { %v4010_v35 = vadd.f32 %v3975_v6, %v3974_v53  ;;  %v4053_v25 = vmul.f32 %v3975_v6, %v3975_v6  ;;  %v5043_v24 = vpop.f32.mrb[4].mxu0  ;;  %v6734_v26 = vpop.permute.xlu0 %3886 }
 0x207   : > { %v5079_v39 = vadd.f32 %v5043_v24, %v4853_v30  ;;  %v3559_v55 = vpop.f32.mrb[5].mxu0 }
 0x208   : > { %v4011_v56 = vadd.f32 %v4010_v35, %v3976_v28  ;;  %v4088_v5 = vadd.f32 %v4053_v25, %v4052_v16  ;;  %v5080_v4 = vadd.f32 %v3559_v55, %v1598_v57  ;;  %v5044_v10 = vpop.f32.mrb[6].mxu0 }
 0x209   : > { %3728 = vst [vmem:[%s6708_s8 + $0x30] sm:$0xff] %v5079_v39  ;;  %v5081_v44 = vadd.f32 %v5044_v10, %v4854_v51  ;;  %v3562_v48 = vpop.f32.mrb[7].mxu0  ;;  %v3980_v63 = vmul.f32 %v5079_v39, %v3827_v7  ;;  %v6728_v51 = vpop.permute.xlu1 %3881 }
 0x20a   : > { %v4089_v49 = vadd.f32 %v4088_v5, %v4054_v59  ;;  %3726 = vst [vmem:[%s6708_s8 + $0x20] sm:$0xff] %v5080_v4  ;;  %v3978_v1 = vmul.f32 %v5080_v4, %v3817_v15  ;;  %v4012_v54 = vadd.f32 %v4011_v56, %v3977_v61  ;;  %v5082_v17 = vadd.f32 %v3562_v48, %v6666_v42  ;;  %v6747_v5 = vpop.permute.xlu0 %3896 }
 0x20b   : > { %3729 = vst [vmem:[%s6708_s8 + $0x38] sm:$0xff] %v5081_v44  ;;  %v3981_v43 = vmul.f32 %v5081_v44, %v3832_v45  ;;  %v4058_v52 = vmul.f32 %v3980_v63, %v3980_v63 }
 0x20c   : > { %v4013_v30 = vadd.f32 %v4012_v54, %v3978_v1  ;;  %v4056_v36 = vmul.f32 %v3978_v1, %v3978_v1  ;;  %v4090_v60 = vadd.f32 %v4089_v49, %v4055_v3  ;;  %3727 = vst [vmem:[%s6708_s8 + $0x28] sm:$0xff] %v5082_v17  ;;  %v3979_v57 = vmul.f32 %v5082_v17, %v6678_v8 }
 0x20d   : > { %v4059_v53 = vmul.f32 %v3981_v43, %v3981_v43 }
 0x20e   : > { %v4091_v32 = vadd.f32 %v4090_v60, %v4056_v36  ;;  %v4014_v20 = vadd.f32 %v4013_v30, %v3979_v57  ;;  %v4057_v15 = vmul.f32 %v3979_v57, %v3979_v57  ;;  %v5047_v0 = vpop.f32.mrb[8].mxu0 }
 0x20f   : > { %v5083_v42 = vadd.f32 %v5047_v0, %v6668_v18  ;;  %v3575_v7 = vpop.f32.mrb[9].mxu0  ;;  %v3907_v0 = vpop.permute.xlu0 %3906 }
 0x210   : > { %v4015_v58 = vadd.f32 %v4014_v20, %v3980_v63  ;;  %v4092_v11 = vadd.f32 %v4091_v32, %v4057_v15  ;;  %v5084_v22 = vadd.f32 %v3575_v7, %v6670_v31  ;;  %v5048_v33 = vpop.f32.mrb[10].mxu0  ;;  %v6741_v31 = vpop.permute.xlu1 %3891 }
 0x211   : > { %3732 = vst [vmem:[%s6708_s8 + $0x50] sm:$0xff] %v5083_v42  ;;  %v5085_v8 = vadd.f32 %v5048_v33, %v6672_v19  ;;  %v3578_v45 = vpop.f32.mrb[11].mxu0  ;;  %v3984_v16 = vmul.f32 %v5083_v42, %v6701_v50 }
 0x212   : > { %v4093_v28 = vadd.f32 %v4092_v11, %v4058_v52  ;;  %3730 = vst [vmem:[%s6708_s8 + $0x40] sm:$0xff] %v5084_v22  ;;  %v3982_v18 = vmul.f32 %v5084_v22, %v6692_v37  ;;  %v4016_v6 = vadd.f32 %v4015_v58, %v3981_v43  ;;  %v5086_v61 = vadd.f32 %v3578_v45, %v6674_v13 }
 0x213   : > { %3733 = vst [vmem:[%s6708_s8 + $0x58] sm:$0xff] %v5085_v8  ;;  %v3985_v39 = vmul.f32 %v5085_v8, %v6704_v47  ;;  %v4062_v4 = vmul.f32 %v3984_v16, %v3984_v16 }
 0x214   : > { %v4017_v35 = vadd.f32 %v4016_v6, %v3982_v18  ;;  %v4060_v25 = vmul.f32 %v3982_v18, %v3982_v18  ;;  %v4094_v24 = vadd.f32 %v4093_v28, %v4059_v53  ;;  %3731 = vst [vmem:[%s6708_s8 + $0x48] sm:$0xff] %v5086_v61  ;;  %v3983_v19 = vmul.f32 %v5086_v61, %v6696_v46  ;;  %v6752_v54 = vpop.permute.xlu1 %3901 }
 0x215   : > { %v4063_v46 = vmul.f32 %v3985_v39, %v3985_v39 }
 0x216   : > { %v4095_v55 = vadd.f32 %v4094_v24, %v4060_v25  ;;  %v4018_v59 = vadd.f32 %v4017_v35, %v3983_v19  ;;  %v4061_v37 = vmul.f32 %v3983_v19, %v3983_v19  ;;  %v5051_v56 = vpop.f32.mrb[12].mxu0  ;;  %v3917_v25 = vpop.permute.xlu0 %3916 }
 0x217   : > { %v5087_v13 = vadd.f32 %v5051_v56, %v6676_v9  ;;  %v3591_v50 = vpop.f32.mrb[13].mxu0 }
 0x218   : > { %v4019_v10 = vadd.f32 %v4018_v59, %v3984_v16  ;;  %v4096_v3 = vadd.f32 %v4095_v55, %v4061_v37  ;;  %v5088_v44 = vadd.f32 %v3591_v50, %v6680_v40  ;;  %v5052_v48 = vpop.f32.mrb[14].mxu0  ;;  %v3912_v58 = vpop.permute.xlu1 %3911 }
 0x219   : > { %3736 = vst [vmem:[%s6708_s8 + $0x70] sm:$0xff] %v5087_v13  ;;  %v5089_v47 = vadd.f32 %v5052_v48, %v6682_v38  ;;  %v3594_v49 = vpop.f32.mrb[15].mxu0  ;;  %v3988_v40 = vmul.f32 %v5087_v13, %v6716_v34 }
 0x21a   : > { %v4097_v9 = vadd.f32 %v4096_v3, %v4062_v4  ;;  %3734 = vst [vmem:[%s6708_s8 + $0x60] sm:$0xff] %v5088_v44  ;;  %v3986_v17 = vmul.f32 %v5088_v44, %v6706_v14  ;;  %v4020_v63 = vadd.f32 %v4019_v10, %v3985_v39  ;;  %v5090_v30 = vadd.f32 %v3594_v49, %v6684_v29  ;;  %v3927_v49 = vpop.permute.xlu0 %3926 }
 0x21b   : > { %v4907_v1 = vpop.f32.mrb[20].mxu1  ;;  %3737 = vst [vmem:[%s6708_s8 + $0x78] sm:$0xff] %v5089_v47  ;;  %v3989_v15 = vmul.f32 %v5089_v47, %v6718_v41  ;;  %v4066_v11 = vmul.f32 %v3988_v40, %v3988_v40 }
 0x21c   : > { %v2109_v36 = vpop.f32.mrb[21].mxu1  ;;  %v4021_v57 = vadd.f32 %v4020_v63, %v3986_v17  ;;  %v4064_v43 = vmul.f32 %v3986_v17, %v3986_v17  ;;  %v4098_v38 = vadd.f32 %v4097_v9, %v4063_v46  ;;  %3735 = vst [vmem:[%s6708_s8 + $0x68] sm:$0xff] %v5090_v30  ;;  %v3987_v32 = vmul.f32 %v5090_v30, %v6711_v2  ;;  %v3922_v13 = vpop.permute.xlu1 %3921 }
 0x21d   : > { %v4908_v60 = vpop.f32.mrb[22].mxu1  ;;  %v4067_v8 = vmul.f32 %v3989_v15, %v3989_v15 }
 0x21e   : > { %v2112_v20 = vpop.f32.mrb[23].mxu1  ;;  %v4099_v14 = vadd.f32 %v4098_v38, %v4064_v43  ;;  %v4022_v42 = vadd.f32 %v4021_v57, %v3987_v32  ;;  %v4065_v7 = vmul.f32 %v3987_v32, %v3987_v32  ;;  %v5055_v29 = vpop.f32.mrb[16].mxu0 }
 0x21f   : > { %v5091_v34 = vadd.f32 %v5055_v29, %v6686_v23  ;;  %v3607_v52 = vpop.f32.mrb[17].mxu0 }
 0x220   : > { %v4023_v22 = vadd.f32 %v4022_v42, %v3988_v40  ;;  %v4100_v33 = vadd.f32 %v4099_v14, %v4065_v7  ;;  %v5092_v2 = vadd.f32 %v3607_v52, %v6688_v62  ;;  %v5056_v53 = vpop.f32.mrb[18].mxu0 }
 0x221   : > { %3740 = vst [vmem:[%s6708_s8 + $0x90] sm:$0xff] %v5091_v34  ;;  %v5093_v41 = vadd.f32 %v5056_v53, %v6690_v12  ;;  %v3610_v45 = vpop.f32.mrb[19].mxu0  ;;  %v3992_v35 = vmul.f32 %v5091_v34, %v6734_v26 }
 0x222   : > { %v4101_v18 = vadd.f32 %v4100_v33, %v4066_v11  ;;  %3738 = vst [vmem:[%s6708_s8 + $0x80] sm:$0xff] %v5092_v2  ;;  %v3990_v23 = vmul.f32 %v5092_v2, %v6724_v21  ;;  %v4024_v6 = vadd.f32 %v4023_v22, %v3989_v15  ;;  %v5094_v61 = vadd.f32 %v3610_v45, %v6694_v27  ;;  %v3932_v15 = vpop.permute.xlu1 %3931 }
 0x223   : > { %v4911_v28 = vpop.f32.mrb[24].mxu1  ;;  %3741 = vst [vmem:[%s6708_s8 + $0x98] sm:$0xff] %v5093_v41  ;;  %v3993_v59 = vmul.f32 %v5093_v41, %v6741_v31  ;;  %v4070_v4 = vmul.f32 %v3992_v35, %v3992_v35 }
 0x224   : > { %v2125_v16 = vpop.f32.mrb[25].mxu1  ;;  %v4025_v24 = vadd.f32 %v4024_v6, %v3990_v23  ;;  %v4068_v19 = vmul.f32 %v3990_v23, %v3990_v23  ;;  %v4102_v39 = vadd.f32 %v4101_v18, %v4067_v8  ;;  %3739 = vst [vmem:[%s6708_s8 + $0x88] sm:$0xff] %v5094_v61  ;;  %v3991_v12 = vmul.f32 %v5094_v61, %v6728_v51 }
 0x225   : > { %v4912_v62 = vpop.f32.mrb[26].mxu1  ;;  %v4071_v46 = vmul.f32 %v3993_v59, %v3993_v59 }
 0x226   : > { %v2128_v55 = vpop.f32.mrb[27].mxu1  ;;  %v4103_v21 = vadd.f32 %v4102_v39, %v4068_v19  ;;  %v4026_v37 = vadd.f32 %v4025_v24, %v3991_v12  ;;  %v4069_v56 = vmul.f32 %v3991_v12, %v3991_v12  ;;  %v5059_v27 = vpop.f32.mrb[20].mxu0 }
 0x227   : > { %v5095_v26 = vadd.f32 %v5059_v27, %v4907_v1  ;;  %v3623_v50 = vpop.f32.mrb[21].mxu0  ;;  %v3942_v6 = vpop.permute.xlu1 %3941 }
 0x228   : > { %v4027_v10 = vadd.f32 %v4026_v37, %v3992_v35  ;;  %v4104_v3 = vadd.f32 %v4103_v21, %v4069_v56  ;;  %v5096_v44 = vadd.f32 %v3623_v50, %v2109_v36  ;;  %v5060_v48 = vpop.f32.mrb[22].mxu0 }
 0x229   : > { %3744 = vst [vmem:[%s6708_s8 + $0xb0] sm:$0xff] %v5095_v26  ;;  %v5097_v51 = vadd.f32 %v5060_v48, %v4908_v60  ;;  %v3626_v47 = vpop.f32.mrb[23].mxu0  ;;  %v3996_v40 = vmul.f32 %v5095_v26, %v3907_v0  ;;  %v3937_v0 = vpop.permute.xlu0 %3936 }
 0x22a   : > { %v4105_v9 = vadd.f32 %v4104_v3, %v4070_v4  ;;  %3742 = vst [vmem:[%s6708_s8 + $0xa0] sm:$0xff] %v5096_v44  ;;  %v3994_v17 = vmul.f32 %v5096_v44, %v6747_v5  ;;  %v4028_v63 = vadd.f32 %v4027_v10, %v3993_v59  ;;  %v5098_v1 = vadd.f32 %v3626_v47, %v2112_v20 }
 0x22b   : > { %v4915_v31 = vpop.f32.mrb[28].mxu1  ;;  %3745 = vst [vmem:[%s6708_s8 + $0xb8] sm:$0xff] %v5097_v51  ;;  %v3997_v14 = vmul.f32 %v5097_v51, %v3912_v58  ;;  %v4074_v52 = vmul.f32 %v3996_v40, %v3996_v40  ;;  %v3952_v44 = vpop.permute.xlu1 %3951 }
 0x22c   : > { %v2141_v30 = vpop.f32.mrb[29].mxu1  ;;  %v4029_v43 = vadd.f32 %v4028_v63, %v3994_v17  ;;  %v4072_v36 = vmul.f32 %v3994_v17, %v3994_v17  ;;  %v4106_v38 = vadd.f32 %v4105_v9, %v4071_v46  ;;  %3743 = vst [vmem:[%s6708_s8 + $0xa8] sm:$0xff] %v5098_v1  ;;  %v3995_v60 = vmul.f32 %v5098_v1, %v6752_v54 }
 0x22d   : > { %v4916_v57 = vpop.f32.mrb[30].mxu1  ;;  %v4075_v53 = vmul.f32 %v3997_v14, %v3997_v14  ;;  %v3947_v59 = vpop.permute.xlu0 %3946 }
 0x22e   : > { %v2144_v32 = vpop.f32.mrb[31].mxu1  ;;  %v4107_v42 = vadd.f32 %v4106_v38, %v4072_v36  ;;  %v4030_v7 = vadd.f32 %v4029_v43, %v3995_v60  ;;  %v4073_v29 = vmul.f32 %v3995_v60, %v3995_v60  ;;  %v5063_v5 = vpop.f32.mrb[24].mxu0 }
 0x22f   : > { %v5099_v20 = vadd.f32 %v5063_v5, %v4911_v28  ;;  %v3639_v34 = vpop.f32.mrb[25].mxu0 }
 0x230   : > { %v4031_v11 = vadd.f32 %v4030_v7, %v3996_v40  ;;  %v4108_v22 = vadd.f32 %v4107_v42, %v4073_v29  ;;  %v5100_v33 = vadd.f32 %v3639_v34, %v2125_v16  ;;  %v5064_v2 = vpop.f32.mrb[26].mxu0 }
 0x231   : > { %3748 = vst [vmem:[%s6708_s8 + $0xd0] sm:$0xff] %v5099_v20  ;;  %v5101_v54 = vadd.f32 %v5064_v2, %v4912_v62  ;;  %v3642_v8 = vpop.f32.mrb[27].mxu0  ;;  %v4000_v61 = vmul.f32 %v5099_v20, %v3927_v49  ;;  %v3957_v17 = vpop.permute.xlu0 %3956 }
 0x232   : > { %v4109_v41 = vadd.f32 %v4108_v22, %v4074_v52  ;;  %3746 = vst [vmem:[%s6708_s8 + $0xc0] sm:$0xff] %v5100_v33  ;;  %v3998_v45 = vmul.f32 %v5100_v33, %v3917_v25  ;;  %v4032_v18 = vadd.f32 %v4031_v11, %v3997_v14  ;;  %v5102_v23 = vadd.f32 %v3642_v8, %v2128_v55 }
 0x233   : > { %v4919_v58 = vpop.f32.mrb[32].mxu1  ;;  %3749 = vst [vmem:[%s6708_s8 + $0xd8] sm:$0xff] %v5101_v54  ;;  %v4001_v62 = vmul.f32 %v5101_v54, %v3932_v15  ;;  %v4078_v26 = vmul.f32 %v4000_v61, %v4000_v61  ;;  %v3962_v15 = vpop.permute.xlu1 %3961 }
 0x234   : > { %v2157_v28 = vpop.f32.mrb[33].mxu1  ;;  %v4033_v24 = vadd.f32 %v4032_v18, %v3998_v45  ;;  %v4076_v19 = vmul.f32 %v3998_v45, %v3998_v45  ;;  %v4110_v16 = vadd.f32 %v4109_v41, %v4075_v53  ;;  %3747 = vst [vmem:[%s6708_s8 + $0xc8] sm:$0xff] %v5102_v23  ;;  %v3999_v39 = vmul.f32 %v5102_v23, %v3922_v13 }
 0x235   : > { %v4920_v35 = vpop.f32.mrb[34].mxu1  ;;  %v4079_v13 = vmul.f32 %v4001_v62, %v4001_v62  ;;  %v3967_v11 = vpop.permute.xlu0 %3966 }
 0x236   : > { %v2160_v12 = vpop.f32.mrb[35].mxu1  ;;  %v4111_v21 = vadd.f32 %v4110_v16, %v4076_v19  ;;  %v4034_v37 = vadd.f32 %v4033_v24, %v3999_v39  ;;  %v4077_v25 = vmul.f32 %v3999_v39, %v3999_v39  ;;  %v5067_v56 = vpop.f32.mrb[28].mxu0 }
 0x237   : > { %v5103_v55 = vadd.f32 %v5067_v56, %v4915_v31  ;;  %v3655_v27 = vpop.f32.mrb[29].mxu0  ;;  %v3972_v18 = vpop.permute.xlu1 %3971 }
 0x238   : > { %v4035_v50 = vadd.f32 %v4034_v37, %v4000_v61  ;;  %v4112_v4 = vadd.f32 %v4111_v21, %v4077_v25  ;;  %v5104_v10 = vadd.f32 %v3655_v27, %v2141_v30  ;;  %v5068_v3 = vpop.f32.mrb[30].mxu0 }
 0x239   : > { %3752 = vst [vmem:[%s6708_s8 + $0xf0] sm:$0xff] %v5103_v55  ;;  %v5105_v48 = vadd.f32 %v5068_v3, %v4916_v57  ;;  %v3658_v46 = vpop.f32.mrb[31].mxu0  ;;  %v4004_v9 = vmul.f32 %v5103_v55, %v3947_v59 }
 0x23a   : > { %v4113_v51 = vadd.f32 %v4112_v4, %v4078_v26  ;;  %3750 = vst [vmem:[%s6708_s8 + $0xe0] sm:$0xff] %v5104_v10  ;;  %v4002_v47 = vmul.f32 %v5104_v10, %v3937_v0  ;;  %v4036_v49 = vadd.f32 %v4035_v50, %v4001_v62  ;;  %v5106_v31 = vadd.f32 %v3658_v46, %v2144_v32 }
 0x23b   : > { %3753 = vst [vmem:[%s6708_s8 + $0xf8] sm:$0xff] %v5105_v48  ;;  %v4005_v43 = vmul.f32 %v5105_v48, %v3952_v44  ;;  %v4082_v42 = vmul.f32 %v4004_v9, %v4004_v9 }
 0x23c   : > { %v4037_v63 = vadd.f32 %v4036_v49, %v4002_v47  ;;  %v4080_v1 = vmul.f32 %v4002_v47, %v4002_v47  ;;  %v4114_v30 = vadd.f32 %v4113_v51, %v4079_v13  ;;  %3751 = vst [vmem:[%s6708_s8 + $0xe8] sm:$0xff] %v5106_v31  ;;  %v4003_v40 = vmul.f32 %v5106_v31, %v3942_v6 }
 0x23d   : > { %v4083_v34 = vmul.f32 %v4005_v43, %v4005_v43 }
 0x23e   : > { %v4115_v36 = vadd.f32 %v4114_v30, %v4080_v1  ;;  %v4038_v57 = vadd.f32 %v4037_v63, %v4003_v40  ;;  %v4081_v38 = vmul.f32 %v4003_v40, %v4003_v40  ;;  %v5071_v60 = vpop.f32.mrb[32].mxu0 }
 0x23f   : > { %v5107_v14 = vadd.f32 %v5071_v60, %v4919_v58  ;;  %v3671_v32 = vpop.f32.mrb[33].mxu0 }
 0x240   : > { %v4039_v7 = vadd.f32 %v4038_v57, %v4004_v9  ;;  %v4116_v29 = vadd.f32 %v4115_v36, %v4081_v38  ;;  %v5108_v5 = vadd.f32 %v3671_v32, %v2157_v28  ;;  %v5072_v20 = vpop.f32.mrb[34].mxu0 }
 0x241   : > { %3756 = vst [vmem:[%s6708_s8 + $0x110] sm:$0xff] %v5107_v14  ;;  %v5109_v0 = vadd.f32 %v5072_v20, %v4920_v35  ;;  %v3674_v52 = vpop.f32.mrb[35].mxu0  ;;  %v4008_v54 = vmul.f32 %v5107_v14, %v3967_v11 }
 0x242   : > { %v4117_v22 = vadd.f32 %v4116_v29, %v4082_v42  ;;  %3754 = vst [vmem:[%s6708_s8 + $0x100] sm:$0xff] %v5108_v5  ;;  %v4006_v33 = vmul.f32 %v5108_v5, %v3957_v17  ;;  %v4040_v2 = vadd.f32 %v4039_v7, %v4005_v43  ;;  %v5110_v53 = vadd.f32 %v3674_v52, %v2160_v12 }
 0x243   : > { %3757 = vst [vmem:[%s6708_s8 + $0x118] sm:$0xff] %v5109_v0 }
 0x244   : > { %v4041_v8 = vadd.f32 %v4040_v2, %v4006_v33  ;;  %v4084_v58 = vmul.f32 %v4006_v33, %v4006_v33  ;;  %v4118_v41 = vadd.f32 %v4117_v22, %v4083_v34  ;;  %3755 = vst [vmem:[%s6708_s8 + $0x108] sm:$0xff] %v5110_v53  ;;  %v4007_v45 = vmul.f32 %v5110_v53, %v3962_v15 }
 0x245   : > { %5531 = shalt.err (!%p5528_p5)
}
 0x246   : > { %s5532_s7 = scalar_lea.hbm %s6797_s13, 4608  ;;  %s5536_s11 = scalar_lea.hbm %s6924_s3, 9216 }
 0x247   : > { %p5533_p6 = scmp.ne.s32.totalorder %s6797_s13, %s5532_s7  ;;  %p5537_p10 = scmp.lt.u32.totalorder %s6797_s13, %s6924_s3 }
 0x248   : > { %p5538_p11 = scmp.lt.u32.totalorder %s5536_s11, %s5532_s7  ;;  %p5540_p13 = scmp.lt.u32.totalorder %s5532_s7, %s6797_s13 }
 0x249   : > { %p5534_p7 = pnand %p5533_p6, %p5736_p4 }
 0x24a   : > { %p5539_p12 = por %p5538_p11, %p5537_p10 }
 0x24b   : > { %p5535_p9 = pneg %p5534_p7 }
 0x24c   : > { %p5541_p0 = por %p5540_p13, %p5539_p12 }
 0x24e   : > { %p5542_p1 = pnand %p5541_p0, %p5535_p9 }
 0x250   : > { %5545 = shalt.err (!%p5542_p1)
}
 0x251   : > { %s5660_s15 = smov 128   ;;  %s5661_s17 = smov 8   ;;  %v4119_v23 = vadd.f32 %v4118_v41, %v4084_v58  ;;  %v4009_v28 = vmul.f32 %v5109_v0, %v3972_v18  ;;  %v4042_v6 = vadd.f32 %v4041_v8, %v4007_v45  ;;  %v4085_v61 = vmul.f32 %v4007_v45, %v4007_v45 }
 0x252   : > { %5375 = dma.vmem_to_hbm [thread:$0]  (%p5736_p4), %s6791_s10, 4608, %s6797_s13, %s4131_s14, %s5660_s15, %s5660_s15, %s5661_s17   ;;  %v4086_v35 = vmul.f32 %v4008_v54, %v4008_v54 }
 0x253   : > { %v4043_v24 = vadd.f32 %v4042_v6, %v4008_v54  ;;  %v4120_v19 = vadd.f32 %v4119_v23, %v4085_v61  ;;  %v4087_v16 = vmul.f32 %v4009_v28, %v4009_v28  ;;  %s6827_s10 = sand.u32 1, %s4316_s24   ;;  %s4555_s13 = sshll.u32 %s5648_s21, 4 }
 0x254   : > { %s255_s14 = scalar_lea.vmem [#allocation4], %s6699_s29  ;;  %s261_s7 = scalar_lea.vmem [#allocation6], %s6699_s29 }
 0x255   : > { %v4044_v39 = vadd.f32 %v4043_v24, %v4009_v28  ;;  %v4121_v12 = vadd.f32 %v4120_v19, %v4086_v35  ;;  %s4170_s27 = sshll.u32 %s255_s14, 4  ;;  %s4184_s8 = sshll.u32 %s261_s7, 4  ;;  %s6839_s27 = int_to_ptr.vmem [resolvable:$true] %s4170_s27  ;;  %s6846_s8 = int_to_ptr.vmem [resolvable:$true] %s4184_s8 }
 0x256   : > { %s6837_s12 = scalar_lea.hbm %s6925_s4, %s4555_s13  ;;  %s6844_s16 = scalar_lea.hbm %s6926_s5, %s4555_s13 }
 0x257   : > { %v4045_v62 = vrot.slane %v4044_v39, 4  ;;  %v4122_v59 = vadd.f32 %v4121_v12, %v4087_v16  ;;  %s4136_s15 = scalar_lea.sflag [#allocation5], %s6827_s10  ;;  %s5546_s17 = scalar_lea.vmem %s6839_s27, 16 }
 0x258   : > { %p5547_p2 = scmp.ne.s32.totalorder %s6839_s27, %s5546_s17  ;;  %s5662_s9 = smov [#allocation4]  }
 0x259   : > { %v4123_v21 = vrot.slane %v4122_v59, 4  ;;  %v4046_v37 = vadd.f32 %v4045_v62, %v4044_v39  ;;  %s5550_s11 = sshll.u32 %s5662_s9, 4  ;;  %s5551_s11 = int_to_ptr.vmem [resolvable:$false] %s5550_s11 }
 0x25a   : > { %p5548_p3 = pnand %p5547_p2, %p5736_p4  ;;  %s5552_s25 = scalar_lea.vmem %s5551_s11, 32 }
 0x25b   : > { %v4047_v25 = vrot.slane %v4046_v37, 2  ;;  %v4124_v56 = vadd.f32 %v4123_v21, %v4122_v59  ;;  %p5553_p6 = scmp.lt.s32.totalorder %s6839_s27, %s5551_s11  ;;  %p5554_p7 = scmp.lt.s32.totalorder %s5552_s25, %s5546_s17 }
 0x25c   : > { %p5549_p5 = pneg %p5548_p3 }
 0x25d   : > { %v4048_v55 = vadd.f32 %v4047_v25, %v4046_v37  ;;  %v4125_v27 = vrot.slane %v4124_v56, 2  ;;  %p5555_p9 = por %p5554_p7, %p5553_p6 }
 0x25f   : > { %v4049_v26 = vrot.slane %v4048_v55, 1  ;;  %v4126_v50 = vadd.f32 %v4125_v27, %v4124_v56  ;;  %p5556_p10 = pnand %p5555_p9, %p5549_p5 }
 0x261   : > { %v4050_v4 = vadd.f32 %v4049_v26, %v4048_v55  ;;  %v4127_v10 = vrot.slane %v4126_v50, 1 }
 0x263   : > { %4051 = vst [vmem:[%s255_s14] sm:$0x1] %v4050_v4  ;;  %v4128_v3 = vadd.f32 %v4127_v10, %v4126_v50 }
 0x264   : > { %5559 = shalt.err (!%p5556_p10)
}
 0x265   : > { %s5560_s13 = scalar_lea.hbm %s6837_s12, 16  ;;  %s5564_s24 = scalar_lea.hbm %s6925_s4, 32 }
 0x266   : > { %p5561_p11 = scmp.ne.s32.totalorder %s6837_s12, %s5560_s13  ;;  %p5565_p0 = scmp.lt.u32.totalorder %s6837_s12, %s6925_s4 }
 0x267   : > { %p5566_p1 = scmp.lt.u32.totalorder %s5564_s24, %s5560_s13  ;;  %p5568_p3 = scmp.lt.u32.totalorder %s5560_s13, %s6837_s12 }
 0x268   : > { %p5562_p12 = pnand %p5561_p11, %p5736_p4 }
 0x269   : > { %p5567_p2 = por %p5566_p1, %p5565_p0 }
 0x26a   : > { %p5563_p13 = pneg %p5562_p12 }
 0x26b   : > { %p5569_p5 = por %p5568_p3, %p5567_p2 }
 0x26d   : > { %p5570_p6 = pnand %p5569_p5, %p5563_p13 }
 0x26f   : > { %5573 = shalt.err (!%p5570_p6)
}
 0x270   : > { %5376 = dma.vmem_to_hbm [thread:$0]  (%p5736_p4), %s6839_s27, 16, %s6837_s12, %s4136_s15   ;;  %4129 = vst [vmem:[%s261_s7] sm:$0x1] %v4128_v3 }
 0x271   : > { %s5574_s25 = scalar_lea.vmem %s6846_s8, 16  ;;  %s5663_s17 = smov [#allocation6]  }
 0x272   : > { %p5575_p7 = scmp.ne.s32.totalorder %s6846_s8, %s5574_s25  ;;  %s5578_s13 = sshll.u32 %s5663_s17, 4  ;;  %s5579_s13 = int_to_ptr.vmem [resolvable:$false] %s5578_s13 }
 0x273   : > { %s5580_s14 = scalar_lea.vmem %s5579_s13, 32  ;;  %p5581_p11 = scmp.lt.s32.totalorder %s6846_s8, %s5579_s13 }
 0x274   : > { %p5576_p9 = pnand %p5575_p7, %p5736_p4  ;;  %p5582_p12 = scmp.lt.s32.totalorder %s5580_s14, %s5574_s25 }
 0x276   : > { %p5577_p10 = pneg %p5576_p9  ;;  %p5583_p13 = por %p5582_p12, %p5581_p11 }
 0x278   : > { %p5584_p0 = pnand %p5583_p13, %p5577_p10 }
 0x27a   : > { %5587 = shalt.err (!%p5584_p0)
}
 0x27b   : > { %s5588_s29 = scalar_lea.hbm %s6844_s16, 16  ;;  %s5592_s12 = scalar_lea.hbm %s6926_s5, 32 }
 0x27c   : > { %p5589_p1 = scmp.ne.s32.totalorder %s6844_s16, %s5588_s29  ;;  %p5593_p5 = scmp.lt.u32.totalorder %s6844_s16, %s6926_s5 }
 0x27d   : > { %p5594_p6 = scmp.lt.u32.totalorder %s5592_s12, %s5588_s29  ;;  %p5596_p9 = scmp.lt.u32.totalorder %s5588_s29, %s6844_s16 }
 0x27e   : > { %p5590_p2 = pnand %p5589_p1, %p5736_p4 }
 0x27f   : > { %p5595_p7 = por %p5594_p6, %p5593_p5 }
 0x280   : > { %p5591_p3 = pneg %p5590_p2 }
 0x281   : > { %p5597_p10 = por %p5596_p9, %p5595_p7 }
 0x283   : > { %p5598_p11 = pnand %p5597_p10, %p5591_p3 }
 0x285   : > { %5601 = shalt.err (!%p5598_p11)
}
 0x286   : > { %5377 = dma.vmem_to_hbm [thread:$0]  (%p5736_p4), %s6846_s8, 16, %s6844_s16, %s4136_s15  }
 0x287 PF: > { %p5391_p12 = scmp.ge.s32.totalorder %s5656_s23, 2  ;;  %s4196_s9 = sand.u32 1, %s5636_s18  }
 0x288   : > { %s4197_s11 = scalar_lea.sflag [#allocation3], %s4196_s9 }
 0x289   : > { %p5382_p13 = pnand %p5391_p12, %p5745_p8 }
 0x28b   : > { %5627 = dma.done.wait (!%p5382_p13), %s4197_s11, 4608  }
 0x28c   : > { %5629 = vsyncadd (!%p5382_p13), %s4197_s11, 4294962688  ;;  %s6930_s25 = sadd.s32 4294967294, %s5656_s23  }
 0x28d   : > { %s4205_s17 = sand.u32 1, %s6930_s25  }
 0x28e   : > { %s4206_s28 = scalar_lea.sflag [#allocation5], %s4205_s17 }
 0x28f   : > { %5631 = dma.done.wait (!%p5382_p13), %s4206_s28, 32  }
 0x290   : > { %5633 = vsyncadd (!%p5382_p13), %s4206_s28, 4294967264  ;;  %s22_s23 = sadd.s32 1, %s5656_s23   ;;  %s6931_s18 = smov %s5640_s19 }
 0x291   : > { %p19_p4 = scmp.ge.s32.totalorder %s22_s23, 4   ;;  %s6932_s19 = smov %s5644_s20 }
 0x292   : > { %s6933_s20 = smov %s5751_s6  ;;  %s6934_s21 = smov %s5652_s22 }
 0x293   : > { %s6935_s22 = smov %s6937_s26  ;;  %21 = sbr.rel (!%p19_p4) target bundleno = 6 (0x6), region = 107 }
 0x29a   :  { %4218 = vsyncpa [#allocation3], 1 }
 0x29b   :  { %4220 = vsyncpa [#allocation3 + $0x1], 1 }
 0x29c   :  { %4221 = vsyncpa [#allocation5], 1 }
 0x29d   :  { %4223 = vsyncpa [#allocation5 + $0x1], 1 }

</bundles_post_ra>
